<compile_context>
chip_gen: v7x
topology: tpu7x:2x2x1
jax: 0.10.0
libtpu: 0.0.40
codegen_flags: <defaults>
</compile_context>

<pallas_src>
import functools
import math

import jax
import jax.numpy as jnp
from jax.experimental import pallas as pl
from jax.experimental.pallas import tpu as pltpu


def _hyperw1_kernel(ally_ref, enemy_ref, wcat_ref, wen_ref, bias_ref,
                    b1_ref, w2_ref, b2_ref, out_ref,
                    *, n_agents, n_enemies, mxu_dtype):
    rows_a, _ = ally_ref.shape          # tb * n_agents
    HE = bias_ref.shape[1]              # hypernet_embed * mixing_embed_dim (h-expanded width)
    Dh = b1_ref.shape[1]                # api_hyper_dim
    E = out_ref.shape[1]                # mixing_embed_dim
    H = HE // E                         # hypernet_embed
    tb = rows_a // n_agents             # batch (bs*t) rows in this tile

    ally = ally_ref[...].astype(mxu_dtype)
    enemy = enemy_ref[...].astype(mxu_dtype)

    # ---- One fused MXU matmul on the shared ally LHS:
    #        cols [0, HE)     : API_InputLayer ally embedding (pre-expanded over e)
    #        cols [HE, HE+Dh) : hyper-MLP hidden-layer pre-activation
    ally_res = jnp.dot(ally, wcat_ref[...].astype(mxu_dtype),
                       preferred_element_type=jnp.float32)
    ally_emb = ally_res[:, :HE]
    h1 = jnp.maximum(ally_res[:, HE:HE + Dh] + b1_ref[...], 0.0)          # (rows_a, Dh)

    enemy_emb = jnp.dot(enemy, wen_ref[...].astype(mxu_dtype),
                        preferred_element_type=jnp.float32)               # (rows_e, HE)

    # ---- API_InputLayer: sum over entities + ReLU, already expanded to width HE so that
    #      hidden[b, h*E + e] == hyper_w1_hidden[b, h] (duplication folded into the weights).
    ally_sum = ally_emb.reshape(tb, n_agents, HE).sum(axis=1)
    enemy_sum = enemy_emb.reshape(tb, n_enemies, HE).sum(axis=1)
    hidden = jnp.maximum(ally_sum + enemy_sum + bias_ref[...], 0.0)       # (tb, HE)
    hidden_rep = jnp.broadcast_to(hidden[:, None, :],
                                  (tb, n_agents, HE)).reshape(rows_a, HE)  # per-agent rows

    # ---- API_HyperW1_OutputLayer second Linear: single MXU matmul, (H+1)*E columns.
    #      Weight block is columns [0, HE) (exactly 2 lane groups for the default config),
    #      the E bias columns start at the aligned HE boundary.
    hyper = jnp.dot(h1.astype(mxu_dtype), w2_ref[...].astype(mxu_dtype),
                    preferred_element_type=jnp.float32) + b2_ref[...]
    hyper_w = hyper[:, :HE]            # column h*E + e  ->  w[h, e]   (torch .view(H+1, E))
    hyper_b = hyper[:, HE:HE + E]      # bias row

    # ---- out[r, e] = sum_h hidden[b(r), h] * hyper_w[r, h*E+e] + hyper_b[r, e]
    # Full-lane-width multiply, then a log2 circular roll-tree over h: after folds with shifts
    # HE/2, HE/4, ..., E the first E lanes hold the per-(row, e) sum (rolls land on the XLU slot).
    prod = hidden_rep * hyper_w
    if H & (H - 1) == 0:                               # power-of-two H (default H=32: 5 folds)
        shift = HE // 2
        while shift >= E:
            prod = prod + pltpu.roll(prod, shift=shift, axis=1)
            shift //= 2
        acc = prod[:, :E]
    else:                                              # generic fallback: static per-h unroll
        acc = jnp.zeros((rows_a, E), jnp.float32)
        for h in range(H):
            acc = acc + prod[:, h * E:(h + 1) * E]

    out_ref[...] = (acc + hyper_b).astype(out_ref.dtype)


def _pick_tb(B):
    """Prefer >= 4 grid steps (2 TensorCores x pipelining on v7x), tile rows multiple of 8,
    and cap the block so intermediates stay well under the default scoped-VMEM limits."""
    for min_steps in (4, 2):
        for cand in (256, 128, 64, 32, 16, 8):
            if B % cand == 0 and B // cand >= min_steps:
                return cand
    return B


def hyperw1_forward(ally_features, enemy_features, params, *,
                    n_agents, n_enemies, tb=None, mxu_dtype=jnp.float32):
    """Pallas HyperW1 forward.  Returns main_w1: (B, 1, n_agents*embed_dim)."""
    w_ally, w_enemy, bias_in, w1, b1, w2, b2 = params
    Fa = ally_features.shape[1]
    Fe = enemy_features.shape[1]
    assert ally_features.shape[0] % n_agents == 0
    B = ally_features.shape[0] // n_agents
    assert enemy_features.shape[0] == B * n_enemies
    H = w_ally.shape[1]
    Dh = w1.shape[1]
    E = w2.shape[1] // (H + 1)
    assert w2.shape[1] == (H + 1) * E
    HE = H * E

    if tb is None:
        tb = _pick_tb(B)
    assert B % tb == 0 and (tb % 8 == 0 or tb == B), (B, tb)

    # ---- Param prep (plain JAX, once per call):
    # fold the h -> (h, e) column duplication into the input-embedding weights (ReLU and the
    # entity-sum commute with column duplication), and fuse the two ally-LHS matmuls into one
    # weight whose internal split point HE is a lane-group boundary for the default config.
    w_ally_exp = jnp.repeat(w_ally, E, axis=1)                    # (Fa, HE)
    w_enemy_exp = jnp.repeat(w_enemy, E, axis=1)                  # (Fe, HE)
    bias_exp = jnp.repeat(bias_in.reshape(1, H), E, axis=1)       # (1, HE)
    w_cat = jnp.concatenate([w_ally_exp, w1], axis=1)             # (Fa, HE + Dh)
    b1_2 = b1.reshape(1, Dh)
    b2_2 = b2.reshape(1, (H + 1) * E)

    rows_a = tb * n_agents
    rows_e = tb * n_enemies

    kernel = functools.partial(_hyperw1_kernel, n_agents=n_agents,
                               n_enemies=n_enemies, mxu_dtype=mxu_dtype)

    out = pl.pallas_call(
        kernel,
        out_shape=jax.ShapeDtypeStruct((B * n_agents, E), jnp.float32),
        grid_spec=pltpu.PrefetchScalarGridSpec(
            num_scalar_prefetch=0,
            grid=(B // tb,),
            in_specs=[
                pl.BlockSpec((rows_a, Fa), lambda i: (i, 0)),
                pl.BlockSpec((rows_e, Fe), lambda i: (i, 0)),
                # Constant-index weight blocks: Pallas skips the re-DMA when the block index
                # does not change between grid steps, so these are fetched once per call.
                pl.BlockSpec(w_cat.shape, lambda i: (0, 0)),
                pl.BlockSpec(w_enemy_exp.shape, lambda i: (0, 0)),
                pl.BlockSpec(bias_exp.shape, lambda i: (0, 0)),
                pl.BlockSpec(b1_2.shape, lambda i: (0, 0)),
                pl.BlockSpec(w2.shape, lambda i: (0, 0)),
                pl.BlockSpec(b2_2.shape, lambda i: (0, 0)),
            ],
            out_specs=pl.BlockSpec((rows_a, E), lambda i: (i, 0)),
        ),
        compiler_params=pltpu.CompilerParams(
            dimension_semantics=("parallel",)),
    )(ally_features, enemy_features, w_cat, w_enemy_exp, bias_exp, b1_2, w2, b2_2)

    # (B*NA, E) row-major already has linear order b*(NA*E) + a*E + e, so this reshape is a
    # free metadata change and matches torch's transpose(1,2).reshape column ordering.
    return out.reshape(B, 1, n_agents * E)


def hyperw1_reference(ally_features, enemy_features, params, *, n_agents, n_enemies):
    """Pure-JAX mirror of the PyTorch forward (for verification)."""
    w_ally, w_enemy, bias_in, w1, b1, w2, b2 = params
    B = ally_features.shape[0] // n_agents
    H = w_ally.shape[1]
    E = w2.shape[1] // (H + 1)
    ally_emb = (ally_features @ w_ally).reshape(B, n_agents, H).sum(axis=1)
    enemy_emb = (enemy_features @ w_enemy).reshape(B, n_enemies, H).sum(axis=1)
    hidden = jax.nn.relu(ally_emb + enemy_emb + bias_in)                       # (B, H)
    h1 = jax.nn.relu(ally_features @ w1 + b1)
    hyper = (h1 @ w2 + b2).reshape(B, n_agents, H + 1, E)
    w = hyper[:, :, :-1]                                                       # (B, NA, H, E)
    b = hyper[:, :, -1:]                                                       # (B, NA, 1, E)
    w = jnp.transpose(w, (0, 2, 1, 3)).reshape(B, H, n_agents * E)
    b = b.reshape(B, 1, n_agents * E)
    return jnp.matmul(hidden[:, None, :], w) + b


if __name__ == "__main__":
    # Small, module-consistent shapes (default SMAC-style config).
    n_agents, n_enemies = 4, 5
    Fa, Fe = 16, 12            # state_ally_feats_size, state_enemy_feats_size
    H = 32                     # hypernet_embed
    E = 8                      # mixing_embed_dim
    Dh = 64                    # api_hyper_dim
    B = 64                     # bs * t  -> default tb heuristic gives a 4-step grid

    key = jax.random.PRNGKey(0)
    ks = jax.random.split(key, 9)

    def unif(k, shape, fan_in):
        bound = 1.0 / math.sqrt(fan_in)
        return jax.random.uniform(k, shape, jnp.float32, -bound, bound)

    # API_InputLayer params (shared_hyper_input_layer_num == 1, both Linears bias=False)
    w_ally_emb = unif(ks[0], (Fa, H), Fa)
    w_enemy_emb = unif(ks[1], (Fe, H), Fe)
    bias_in = unif(ks[2], (H,), Fe * n_enemies + Fa * n_agents)
    # API_HyperW1_OutputLayer params: Linear(Fa, Dh) -> ReLU -> Linear(Dh, H*E + E)
    w1 = unif(ks[3], (Fa, Dh), Fa)
    b1 = unif(ks[4], (Dh,), Fa)
    w2 = unif(ks[5], (Dh, (H + 1) * E), Dh)
    b2 = unif(ks[6], ((H + 1) * E,), Dh)
    params = (w_ally_emb, w_enemy_emb, bias_in, w1, b1, w2, b2)

    ally_features = jax.random.normal(ks[7], (B * n_agents, Fa), jnp.float32)
    enemy_features = jax.random.normal(ks[8], (B * n_enemies, Fe), jnp.float32)

    ref = hyperw1_reference(ally_features, enemy_features, params,
                            n_agents=n_agents, n_enemies=n_enemies)

    # f32 MXU path (exact semantics of the torch module).
    out = hyperw1_forward(ally_features, enemy_features, params,
                          n_agents=n_agents, n_enemies=n_enemies)
    out = jax.block_until_ready(out)
    assert out.shape == (B, 1, n_agents * E), out.shape
    assert jnp.allclose(out, ref, atol=1e-4, rtol=1e-4), "f32 mismatch vs JAX reference"

    # bf16 MXU operands with f32 accumulation (perf mode); loose sanity check only.
    out_bf16 = hyperw1_forward(ally_features, enemy_features, params,
                               n_agents=n_agents, n_enemies=n_enemies,
                               mxu_dtype=jnp.bfloat16)
    out_bf16 = jax.block_until_ready(out_bf16)
    assert jnp.allclose(out_bf16, ref, atol=0.5, rtol=0.1), "bf16 path sanity check failed"

    print("KERNEL_OK")
</pallas_src>

<mosaic_0001>
module attributes {stable_mosaic.version = 11 : i64} {
  func.func @_hyperw1_kernel(%arg0: i32, %arg1: memref<64x16xf32, #tpu.memory_space<vmem>>, %arg2: memref<80x12xf32, #tpu.memory_space<vmem>>, %arg3: memref<16x320xf32, #tpu.memory_space<vmem>>, %arg4: memref<12x256xf32, #tpu.memory_space<vmem>>, %arg5: memref<1x256xf32, #tpu.memory_space<vmem>>, %arg6: memref<1x64xf32, #tpu.memory_space<vmem>>, %arg7: memref<64x264xf32, #tpu.memory_space<vmem>>, %arg8: memref<1x264xf32, #tpu.memory_space<vmem>>, %arg9: memref<64x8xf32, #tpu.memory_space<vmem>>) attributes {dimension_semantics = [#tpu.dimension_semantics<parallel>], iteration_bounds = array<i64: 4>, scalar_prefetch = 0 : i64, scratch_operands = 0 : i64, tpu.core_type = #tpu.core_type<tc>, window_params = [{transform_indices = @transform_0, window_bounds = array<i64: 64, 16>}, {transform_indices = @transform_1, window_bounds = array<i64: 80, 12>}, {pipeline_mode = #tpu.pipeline_mode<synchronous>, transform_indices = @transform_2, window_bounds = array<i64: 16, 320>}, {pipeline_mode = #tpu.pipeline_mode<synchronous>, transform_indices = @transform_3, window_bounds = array<i64: 12, 256>}, {pipeline_mode = #tpu.pipeline_mode<synchronous>, transform_indices = @transform_4, window_bounds = array<i64: 1, 256>}, {pipeline_mode = #tpu.pipeline_mode<synchronous>, transform_indices = @transform_5, window_bounds = array<i64: 1, 64>}, {pipeline_mode = #tpu.pipeline_mode<synchronous>, transform_indices = @transform_6, window_bounds = array<i64: 64, 264>}, {pipeline_mode = #tpu.pipeline_mode<synchronous>, transform_indices = @transform_7, window_bounds = array<i64: 1, 264>}, {transform_indices = @transform_8, window_bounds = array<i64: 64, 8>}]} {
    %c0 = arith.constant 0 : index
    %c0_0 = arith.constant 0 : index
    %0 = vector.load %arg1[%c0, %c0_0] : memref<64x16xf32, #tpu.memory_space<vmem>>, vector<64x16xf32>
    %c0_1 = arith.constant 0 : index
    %c0_2 = arith.constant 0 : index
    %1 = vector.load %arg2[%c0_1, %c0_2] : memref<80x12xf32, #tpu.memory_space<vmem>>, vector<80x12xf32>
    %c0_3 = arith.constant 0 : index
    %c0_4 = arith.constant 0 : index
    %2 = vector.load %arg3[%c0_3, %c0_4] : memref<16x320xf32, #tpu.memory_space<vmem>>, vector<16x320xf32>
    %cst = arith.constant dense<0.000000e+00> : vector<64x320xf32>
    %3 = tpu.matmul %0, %2, %cst {dimension_numbers = #tpu.dot_dimension_numbers<[1], [0], [0], [1], [0, 0, 1, 1], [], []>} : vector<64x16xf32>, vector<16x320xf32>, vector<64x320xf32> -> vector<64x320xf32>
    %4 = vector.extract_strided_slice %3 {offsets = [0, 0], sizes = [64, 256], strides = [1, 1]} : vector<64x320xf32> to vector<64x256xf32>
    %5 = vector.extract_strided_slice %3 {offsets = [0, 256], sizes = [64, 64], strides = [1, 1]} : vector<64x320xf32> to vector<64x64xf32>
    %c0_5 = arith.constant 0 : index
    %c0_6 = arith.constant 0 : index
    %6 = vector.load %arg6[%c0_5, %c0_6] : memref<1x64xf32, #tpu.memory_space<vmem>>, vector<1x64xf32>
    %7 = vector.broadcast %6 : vector<1x64xf32> to vector<64x64xf32>
    %8 = arith.addf %5, %7 : vector<64x64xf32>
    %cst_7 = arith.constant 0.000000e+00 : f32
    %9 = vector.broadcast %cst_7 : f32 to vector<64x64xf32>
    %10 = arith.maximumf %8, %9 : vector<64x64xf32>
    %c0_8 = arith.constant 0 : index
    %c0_9 = arith.constant 0 : index
    %11 = vector.load %arg4[%c0_8, %c0_9] : memref<12x256xf32, #tpu.memory_space<vmem>>, vector<12x256xf32>
    %cst_10 = arith.constant dense<0.000000e+00> : vector<80x256xf32>
    %12 = tpu.matmul %1, %11, %cst_10 {dimension_numbers = #tpu.dot_dimension_numbers<[1], [0], [0], [1], [0, 0, 1, 1], [], []>} : vector<80x12xf32>, vector<12x256xf32>, vector<80x256xf32> -> vector<80x256xf32>
    %13 = vector.shape_cast %4 : vector<64x256xf32> to vector<16x4x256xf32>
    %cst_11 = arith.constant dense<0.000000e+00> : vector<16x256xf32>
    %14 = vector.multi_reduction <add>, %13, %cst_11 [1] : vector<16x4x256xf32> to vector<16x256xf32>
    %15 = vector.shape_cast %12 : vector<80x256xf32> to vector<16x5x256xf32>
    %cst_12 = arith.constant dense<0.000000e+00> : vector<16x256xf32>
    %16 = vector.multi_reduction <add>, %15, %cst_12 [1] : vector<16x5x256xf32> to vector<16x256xf32>
    %17 = arith.addf %14, %16 : vector<16x256xf32>
    %c0_13 = arith.constant 0 : index
    %c0_14 = arith.constant 0 : index
    %18 = vector.load %arg5[%c0_13, %c0_14] : memref<1x256xf32, #tpu.memory_space<vmem>>, vector<1x256xf32>
    %19 = vector.broadcast %18 : vector<1x256xf32> to vector<16x256xf32>
    %20 = arith.addf %17, %19 : vector<16x256xf32>
    %cst_15 = arith.constant 0.000000e+00 : f32
    %21 = vector.broadcast %cst_15 : f32 to vector<16x256xf32>
    %22 = arith.maximumf %20, %21 : vector<16x256xf32>
    %23 = vector.shape_cast %22 : vector<16x256xf32> to vector<16x1x256xf32>
    %24 = vector.shape_cast %23 : vector<16x1x256xf32> to vector<16x1x256xf32>
    %25 = vector.broadcast %24 : vector<16x1x256xf32> to vector<16x4x256xf32>
    %26 = vector.shape_cast %25 : vector<16x4x256xf32> to vector<64x256xf32>
    %c0_16 = arith.constant 0 : index
    %c0_17 = arith.constant 0 : index
    %27 = vector.load %arg7[%c0_16, %c0_17] : memref<64x264xf32, #tpu.memory_space<vmem>>, vector<64x264xf32>
    %cst_18 = arith.constant dense<0.000000e+00> : vector<64x264xf32>
    %28 = tpu.matmul %10, %27, %cst_18 {dimension_numbers = #tpu.dot_dimension_numbers<[1], [0], [0], [1], [0, 0, 1, 1], [], []>} : vector<64x64xf32>, vector<64x264xf32>, vector<64x264xf32> -> vector<64x264xf32>
    %c0_19 = arith.constant 0 : index
    %c0_20 = arith.constant 0 : index
    %29 = vector.load %arg8[%c0_19, %c0_20] : memref<1x264xf32, #tpu.memory_space<vmem>>, vector<1x264xf32>
    %30 = vector.broadcast %29 : vector<1x264xf32> to vector<64x264xf32>
    %31 = arith.addf %28, %30 : vector<64x264xf32>
    %32 = vector.extract_strided_slice %31 {offsets = [0, 0], sizes = [64, 256], strides = [1, 1]} : vector<64x264xf32> to vector<64x256xf32>
    %33 = vector.extract_strided_slice %31 {offsets = [0, 256], sizes = [64, 8], strides = [1, 1]} : vector<64x264xf32> to vector<64x8xf32>
    %34 = arith.mulf %26, %32 : vector<64x256xf32>
    %c128_i32 = arith.constant 128 : i32
    %35 = tpu.dynamic_rotate %34 by %c128_i32 dim 1 : vector<64x256xf32>, i32 -> vector<64x256xf32>
    %36 = arith.addf %34, %35 : vector<64x256xf32>
    %c64_i32 = arith.constant 64 : i32
    %37 = tpu.dynamic_rotate %36 by %c64_i32 dim 1 : vector<64x256xf32>, i32 -> vector<64x256xf32>
    %38 = arith.addf %36, %37 : vector<64x256xf32>
    %c32_i32 = arith.constant 32 : i32
    %39 = tpu.dynamic_rotate %38 by %c32_i32 dim 1 : vector<64x256xf32>, i32 -> vector<64x256xf32>
    %40 = arith.addf %38, %39 : vector<64x256xf32>
    %c16_i32 = arith.constant 16 : i32
    %41 = tpu.dynamic_rotate %40 by %c16_i32 dim 1 : vector<64x256xf32>, i32 -> vector<64x256xf32>
    %42 = arith.addf %40, %41 : vector<64x256xf32>
    %c8_i32 = arith.constant 8 : i32
    %43 = tpu.dynamic_rotate %42 by %c8_i32 dim 1 : vector<64x256xf32>, i32 -> vector<64x256xf32>
    %44 = arith.addf %42, %43 : vector<64x256xf32>
    %45 = vector.extract_strided_slice %44 {offsets = [0, 0], sizes = [64, 8], strides = [1, 1]} : vector<64x256xf32> to vector<64x8xf32>
    %46 = arith.addf %45, %33 : vector<64x8xf32>
    %c0_21 = arith.constant 0 : index
    %c0_22 = arith.constant 0 : index
    %47 = vector.load %arg9[%c0_21, %c0_22] : memref<64x8xf32, #tpu.memory_space<vmem>>, vector<64x8xf32>
    tpu.vector_store %arg9[%c0_21, %c0_22], %46 {strides = array<i32>} : memref<64x8xf32, #tpu.memory_space<vmem>>, vector<64x8xf32>,
    return
  }
  func.func @transform_0(%arg0: i32) -> (i32, i32) {
    %c0_i32 = arith.constant 0 : i32
    %c0_i32_0 = arith.constant 0 : i32
    return %arg0, %c0_i32 : i32, i32
  }
  func.func @transform_1(%arg0: i32) -> (i32, i32) {
    %c0_i32 = arith.constant 0 : i32
    %c0_i32_0 = arith.constant 0 : i32
    return %arg0, %c0_i32 : i32, i32
  }
  func.func @transform_2(%arg0: i32) -> (i32, i32) {
    %c0_i32 = arith.constant 0 : i32
    %c0_i32_0 = arith.constant 0 : i32
    %c0_i32_1 = arith.constant 0 : i32
    return %c0_i32, %c0_i32_0 : i32, i32
  }
  func.func @transform_3(%arg0: i32) -> (i32, i32) {
    %c0_i32 = arith.constant 0 : i32
    %c0_i32_0 = arith.constant 0 : i32
    %c0_i32_1 = arith.constant 0 : i32
    return %c0_i32, %c0_i32_0 : i32, i32
  }
  func.func @transform_4(%arg0: i32) -> (i32, i32) {
    %c0_i32 = arith.constant 0 : i32
    %c0_i32_0 = arith.constant 0 : i32
    %c0_i32_1 = arith.constant 0 : i32
    return %c0_i32, %c0_i32_0 : i32, i32
  }
  func.func @transform_5(%arg0: i32) -> (i32, i32) {
    %c0_i32 = arith.constant 0 : i32
    %c0_i32_0 = arith.constant 0 : i32
    %c0_i32_1 = arith.constant 0 : i32
    return %c0_i32, %c0_i32_0 : i32, i32
  }
  func.func @transform_6(%arg0: i32) -> (i32, i32) {
    %c0_i32 = arith.constant 0 : i32
    %c0_i32_0 = arith.constant 0 : i32
    %c0_i32_1 = arith.constant 0 : i32
    return %c0_i32, %c0_i32_0 : i32, i32
  }
  func.func @transform_7(%arg0: i32) -> (i32, i32) {
    %c0_i32 = arith.constant 0 : i32
    %c0_i32_0 = arith.constant 0 : i32
    %c0_i32_1 = arith.constant 0 : i32
    return %c0_i32, %c0_i32_0 : i32, i32
  }
  func.func @transform_8(%arg0: i32) -> (i32, i32) {
    %c0_i32 = arith.constant 0 : i32
    %c0_i32_0 = arith.constant 0 : i32
    return %arg0, %c0_i32 : i32, i32
  }
}

</mosaic_0001>

<bundles_post_ra>
// kernel: tpu_custom_call.1
= control target key start
LH: loop header
LB: loop body
LE: loop exit
PB: predicated region body
PF: predicated region fallthrough
CT: control target
= control target key end

     0   :  { %s4584_s27 = smov 0   ;;  %s6541_s0 = inlined_call_operand.vmem [shape: f32[256,16], index: 0, kind: input, shape index: {}]   ;;  %s6542_s1 = inlined_call_operand.vmem [shape: f32[320,12], index: 1, kind: input, shape index: {}]   ;;  %s6543_s2 = inlined_call_operand.vmem [shape: f32[16,320], index: 2, kind: input, shape index: {}]   ;;  %s6544_s3 = inlined_call_operand.vmem [shape: f32[12,256], index: 3, kind: input, shape index: {}]   ;;  %s6545_s4 = inlined_call_operand.vmem [shape: f32[1,256], index: 4, kind: input, shape index: {}]   ;;  %s6546_s5 = inlined_call_operand.vmem [shape: f32[1,64], index: 5, kind: input, shape index: {}]   ;;  %s6547_s6 = inlined_call_operand.vmem [shape: f32[64,264], index: 6, kind: input, shape index: {}]   ;;  %s6548_s7 = inlined_call_operand.vmem [shape: f32[1,264], index: 7, kind: input, shape index: {}]   ;;  %s6549_s8 = inlined_call_operand.vmem [shape: f32[256,8], index: 8, kind: output, shape index: {}]  }
   0x1 LB: > { %s4288_s28 = sadd.s32 4294967295, %s4530_s27   ;;  %p4292_p0 = scmp.ge.s32.totalorder %s4530_s27, 1  ;;  %s4530_s27 = sphi %s4584_s27, %s18_s27  }
   0x2   : > { %p274_p1 = scmp.lt.s32.totalorder %s4530_s27, 5 }
   0x4   : > { %p275_p2 = pnand %p4292_p0, %p274_p1 }
   0x6   : > { %278 = sbr.rel (%p275_p2) target bundleno = 1034 (0x40a), region = 52 }
   0xd   : > { %v351_v0 = vld [vmem:[%s6543_s2 + $0x10] sm:$0xff]  ;;  %v354_v1 = vld [vmem:[%s6543_s2 + $0x28] sm:$0xff]  ;;  %s4293_s11 = sshll.u32 %s4288_s28, 3  ;;  %vm656_vm0 = vcmask 1043456   ;;  %v624_v4 = vld [vmem:[%s6544_s3 + $0x18] sm:$0xf] }
   0xe   : > { %v622_v2 = vld [vmem:[%s6544_s3 + $0x8] sm:$0xff]  ;;  %v4459_v3 = vpack.c.bf16 %v354_v1, %v351_v0  ;;  %p314_p3 = scmp.lt.s32.totalorder %s4293_s11, 31  ;;  %v621_v5 = vld [vmem:[%s6544_s3] sm:$0xff]  ;;  %vm4532_vm1 = vmmov 1   ;;  %v623_v8 = vld [vmem:[%s6544_s3 + $0x10] sm:$0xf] }
   0xf   : > { %v4463_v6 = vpack.c.bf16 %v624_v4, %v622_v2  ;;  %vm4608_vm2 = vmpackc.low %vm656_vm0, %vm4532_vm1  ;;  %v350_v9 = vld [vmem:[%s6543_s2 + $0x8] sm:$0xff]  ;;  %v4533_v10 = vmov 0.0   ;;  %v353_v11 = vld [vmem:[%s6543_s2 + $0x20] sm:$0xff]  ;;  %s4630_s30 = smul.u32 10, %s4288_s28  ;;  %vm355_vm3 = vcmask 130048   ;;  %v4466_v21 = vpack.c.bf16 %v623_v8, %v621_v5  ;;  %s4537_s17 = smov 16  }
  0x10   : > { %444 = vmatprep.mubr.f32.mxu0 %v4533_v10  ;;  %4460 = vmatprep.subr.bf16.mxu1 %v4459_v3  ;;  %s6662_s11 = smov (!%p314_p3, %s4293_s11), 31  ;;  %v349_v12 = vld [vmem:[%s6543_s2] sm:$0xff]  ;;  %v352_v13 = vld [vmem:[%s6543_s2 + $0x18] sm:$0xff]  ;;  %v4455_v14 = vpack.c.bf16 %v353_v11, %v350_v9  ;;  %v3066_v16 = vld [vmem:[%s6547_s6 + $0x8] sm:$0xff]  ;;  %vm625_vm4 = vcmask 97280   ;;  %vm3106_vm5 = vcmask 523264  }
  0x11   : > { %4462 = vmatpush3.bf16.msra.mxu1 %v4459_v3  ;;  %v4457_v15 = vpack.c.bf16 %v352_v13, %v349_v12  ;;  %v3069_v17 = vld [vmem:[%s6547_s6 + $0x20] sm:$0xff]  ;;  %s4294_s14 = sshll.u32 %s6662_s11, 3  ;;  %v3068_v20 = vld [vmem:[%s6547_s6 + $0x18] sm:$0xff]  ;;  %v3075_v23 = vld [vmem:[%s6547_s6 + $0x50] sm:$0xff]  ;;  %p320_p4 = scmp.lt.s32.totalorder %s4630_s30, 39  ;;  %vm2540_vm6 = vcmask 1044480  }
  0x12   : > { %4465 = vmatprep.subr.msk.bf16.mxu1 %vm4608_vm2, %v4463_v6  ;;  %v4469_v18 = vpack.c.bf16 %v3069_v17, %v3066_v16  ;;  %v3065_v19 = vld [vmem:[%s6547_s6] sm:$0xff]  ;;  %s4652_s20 = scalar_lea.vmem %s6541_s0, %s4294_s14  ;;  %4456 = vmatprep.subr.bf16.mxu0 %v4455_v14  ;;  %v3072_v22 = vld [vmem:[%s6547_s6 + $0x38] sm:$0xff]  ;;  %v3071_v29 = vld [vmem:[%s6547_s6 + $0x30] sm:$0xff]  ;;  %v6550_v14 = vlaneseq  ;;  %s4538_s18 = smov 8   ;;  %vm4211_vm11 = vcmask 64512  }
  0x13   : > { %v331_v24 = vld [vmem:[%s4652_s20] sm:$0xff]  ;;  %v332_v25 = vld [vmem:[%s4652_s20 + $0x8] sm:$0xff]  ;;  %v333_v26 = vld [vmem:[%s4652_s20 + $0x10] sm:$0xff]  ;;  %4458 = vmatpush1.bf16.msra.mxu0 %v4457_v15  ;;  %v4471_v27 = vpack.c.bf16 %v3068_v20, %v3065_v19  ;;  %v4473_v28 = vpack.c.bf16 %v3075_v23, %v3072_v22  ;;  %s6664_s30 = smov (!%p320_p4, %s4630_s30), 39  ;;  %s6457_s22 = scalar_lea.vmem %s6549_s8, %s4294_s14 }
  0x14   : > { %4415 = vmatprep.mubr.msk.f32.mxu1 %vm355_vm3, %v331_v24  ;;  %4470 = vmatprep.subr.bf16.mxu0 %v4469_v18  ;;  %v3074_v30 = vld [vmem:[%s6547_s6 + $0x48] sm:$0xff]  ;;  %v334_v31 = vld [vmem:[%s4652_s20 + $0x18] sm:$0xff]  ;;  %v3081_v33 = vld [vmem:[%s6547_s6 + $0x80] sm:$0xff]  ;;  %s4295_s9 = sshll.u32 %s6664_s30, 3 }
  0x15   : > { %4416 = vmatmul.mubr.msk.f32.vlgmr.msra.gmra.mrb[0].mxu1 %vm355_vm3, %v332_v25  ;;  %v3078_v32 = vld [vmem:[%s6547_s6 + $0x68] sm:$0xff]  ;;  %v335_v34 = vld [vmem:[%s4652_s20 + $0x20] sm:$0xff]  ;;  %v4475_v35 = vpack.c.bf16 %v3074_v30, %v3071_v29  ;;  %v3067_v36 = vld [vmem:[%s6547_s6 + $0x10] sm:$0xff]  ;;  %s4730_s16 = scalar_lea.vmem %s6542_s1, %s4295_s9 }
  0x16   : > { %4418 = vmatprep.mubr.msk.f32.mxu1 %vm355_vm3, %v333_v26  ;;  %4468 = vmatpush1.bf16.msk.msra.mxu1 %vm4608_vm2, %v4466_v21  ;;  %v4477_v37 = vpack.c.bf16 %v3081_v33, %v3078_v32  ;;  %v3077_v38 = vld [vmem:[%s6547_s6 + $0x60] sm:$0xff]  ;;  %v3080_v39 = vld [vmem:[%s6547_s6 + $0x78] sm:$0xff]  ;;  %v336_v40 = vld [vmem:[%s4652_s20 + $0x28] sm:$0xff] }
  0x17   : > { %4298 = vmatmul.mubr.msk.f32.vlgmr.msra.gmra.mrb[0].mxu0 %vm355_vm3, %v331_v24  ;;  %v3070_v41 = vld [vmem:[%s6547_s6 + $0x28] sm:$0xff]  ;;  %v3084_v42 = vld [vmem:[%s6547_s6 + $0x98] sm:$0xff]  ;;  %v337_v43 = vld [vmem:[%s4652_s20 + $0x30] sm:$0xff]  ;;  %v4479_v46 = vpack.c.bf16 %v3080_v39, %v3077_v38  ;;  %v4534_v24 = vmov 1966171168  }
  0x18   : > { %450 = vmatprep.mubr.f32.mxu0 %v4533_v10  ;;  %4472 = vmatpush1.bf16.msra.mxu0 %v4471_v27  ;;  %v4710_v44 = vpack.c.bf16 %v3070_v41, %v3067_v36  ;;  %v3087_v45 = vld [vmem:[%s6547_s6 + $0xb0] sm:$0xff]  ;;  %v3086_v49 = vld [vmem:[%s6547_s6 + $0xa8] sm:$0xff]  ;;  %v338_v50 = vld [vmem:[%s4652_s20 + $0x38] sm:$0xff]  ;;  %s4536_s20 = smov 32  }
  0x19   : > { %4419 = vmatmul.mubr.msk.f32.gmra.mrb[2].mxu1 %vm355_vm3, %v334_v31  ;;  %4474 = vmatprep.subr.bf16.mxu0 %v4473_v28  ;;  %v4481_v47 = vpack.c.bf16 %v3087_v45, %v3084_v42  ;;  %v3083_v48 = vld [vmem:[%s6547_s6 + $0x90] sm:$0xff]  ;;  %v339_v52 = vld [vmem:[%s4730_s16] sm:$0xff]  ;;  %v340_v53 = vld [vmem:[%s4730_s16 + $0x8] sm:$0xff] }
  0x1a   : > { %4421 = vmatprep.mubr.msk.f32.mxu1 %vm355_vm3, %v335_v34  ;;  %4501 = vmatprep.subr.bf16.mxu1 %v4710_v44  ;;  %v4483_v51 = vpack.c.bf16 %v3086_v49, %v3083_v48  ;;  %v341_v54 = vld [vmem:[%s4730_s16 + $0x10] sm:$0xff]  ;;  %v342_v55 = vld [vmem:[%s4730_s16 + $0x18] sm:$0xff]  ;;  %v343_v56 = vld [vmem:[%s4730_s16 + $0x20] sm:$0xff]  ;;  %v4856_v48 = vshrl.u32 %v6550_v14, 7 }
  0x1b   : > { %4299 = vmatmul.mubr.msk.f32.gmra.mrb[2].mxu0 %vm355_vm3, %v332_v25  ;;  %v344_v57 = vld [vmem:[%s4730_s16 + $0x28] sm:$0xff]  ;;  %v345_v58 = vld [vmem:[%s4730_s16 + $0x30] sm:$0xff]  ;;  %v346_v59 = vld [vmem:[%s4730_s16 + $0x38] sm:$0xff]  ;;  %v4823_v25 = vunpack.c.l.s4 %v4534_v24 }
  0x1c   : > { %456 = vmatprep.mubr.f32.mxu0 %v4533_v10  ;;  %4476 = vmatpush1.bf16.msra.mxu0 %v4475_v35  ;;  %v347_v60 = vld [vmem:[%s4730_s16 + $0x40] sm:$0xff]  ;;  %v348_v61 = vld [vmem:[%s4730_s16 + $0x48] sm:$0xff]  ;;  %v3076_v63 = vld [vmem:[%s6547_s6 + $0x58] sm:$0xff]  ;;  %s4535_s16 = smov 64  }
  0x1d   : > { %4422 = vmatmul.mubr.msk.f32.gmra.mrb[4].mxu1 %vm355_vm3, %v336_v40  ;;  %4478 = vmatprep.subr.bf16.mxu0 %v4477_v37  ;;  %v3073_v62 = vld [vmem:[%s6547_s6 + $0x40] sm:$0xff]  ;;  %v3079_v1 = vld [vmem:[%s6547_s6 + $0x70] sm:$0xff]  ;;  %v3082_v2 = vld [vmem:[%s6547_s6 + $0x88] sm:$0xff] }
  0x1e   : > { %4424 = vmatprep.mubr.msk.f32.mxu1 %vm355_vm3, %v337_v43  ;;  %v4783_v0 = vpack.c.bf16 %v3076_v63, %v3073_v62  ;;  %v4793_v3 = vpack.c.bf16 %v3082_v2, %v3079_v1  ;;  %v3085_v4 = vld [vmem:[%s6547_s6 + $0xa0] sm:$0xff]  ;;  %v3088_v5 = vld [vmem:[%s6547_s6 + $0xb8] sm:$0xff] }
  0x1f   : > { %4300 = vmatmul.mubr.msk.f32.gmra.mrb[4].mxu0 %vm355_vm3, %v333_v26  ;;  %v4803_v6 = vpack.c.bf16 %v3088_v5, %v3085_v4  ;;  %v4810_v7 = vld [vmem:[%s6546_s5] ss:$0 sm:$0xff] }
  0x20   : > { %462 = vmatprep.mubr.f32.mxu0 %v4533_v10  ;;  %4480 = vmatpush1.bf16.msra.mxu0 %v4479_v46 }
  0x21   : > { %4425 = vmatmul.mubr.msk.f32.gmra.mrb[6].mxu1 %vm355_vm3, %v338_v50  ;;  %4482 = vmatprep.subr.bf16.mxu0 %v4481_v47 }
  0x22   : > { %727 = vmatprep.mubr.f32.mxu1 %v4533_v10 }
  0x23   : > { %4301 = vmatmul.mubr.msk.f32.gmra.mrb[6].mxu0 %vm355_vm3, %v334_v31 }
  0x24   : > { %468 = vmatprep.mubr.f32.mxu0 %v4533_v10  ;;  %4484 = vmatpush1.bf16.msra.mxu0 %v4483_v51 }
  0x25   : > { %4317 = vmatmul.mubr.msk.f32.vlgmr.msra.gmra.mrb[8].mxu1 %vm625_vm4, %v339_v52  ;;  %4486 = vmatprep.subr.bf16.mxu0 %v4710_v44 }
  0x26   : > { %733 = vmatprep.mubr.f32.mxu1 %v4533_v10  ;;  %4505 = vmatpush3.bf16.msra.mxu1 %v4710_v44 }
  0x27   : > { %4302 = vmatmul.mubr.msk.f32.gmra.mrb[8].mxu0 %vm355_vm3, %v335_v34  ;;  %4502 = vmatprep.subr.bf16.mxu1 %v4783_v0 }
  0x28   : > { %474 = vmatprep.mubr.f32.mxu0 %v4533_v10 }
  0x29   : > { %4318 = vmatmul.mubr.msk.f32.gmra.mrb[10].mxu1 %vm625_vm4, %v340_v53  ;;  %v1116_v53 = vunpack.c.0.s8 %v4823_v25 }
  0x2a   : > { %739 = vmatprep.mubr.f32.mxu1 %v4533_v10  ;;  %4506 = vmatpush3.bf16.msra.mxu1 %v4783_v0 }
  0x2b   : > { %4303 = vmatmul.mubr.msk.f32.gmra.mrb[10].mxu0 %vm355_vm3, %v336_v40  ;;  %4503 = vmatprep.subr.bf16.mxu1 %v4793_v3 }
  0x2c   : > { %480 = vmatprep.mubr.f32.mxu0 %v4533_v10 }
  0x2d   : > { %4319 = vmatmul.mubr.msk.f32.gmra.mrb[12].mxu1 %vm625_vm4, %v341_v54 }
  0x2e   : > { %745 = vmatprep.mubr.f32.mxu1 %v4533_v10  ;;  %4507 = vmatpush3.bf16.msra.mxu1 %v4793_v3 }
  0x2f   : > { %4304 = vmatmul.mubr.msk.f32.gmra.mrb[12].mxu0 %vm355_vm3, %v337_v43  ;;  %4504 = vmatprep.subr.bf16.mxu1 %v4803_v6 }
  0x30   : > { %486 = vmatprep.mubr.f32.mxu0 %v4533_v10 }
  0x31   : > { %4320 = vmatmul.mubr.msk.f32.gmra.mrb[14].mxu1 %vm625_vm4, %v342_v55 }
  0x32   : > { %751 = vmatprep.mubr.f32.mxu1 %v4533_v10  ;;  %4508 = vmatpush3.bf16.msra.mxu1 %v4803_v6 }
  0x33   : > { %4305 = vmatmul.mubr.msk.f32.gmra.mrb[14].mxu0 %vm355_vm3, %v338_v50 }
  0x34   : > { %3195 = vmatprep.mubr.f32.mxu0 %v4533_v10 }
  0x35   : > { %4321 = vmatmul.mubr.msk.f32.gmra.mrb[16].mxu1 %vm625_vm4, %v343_v56 }
  0x36   : > { %757 = vmatprep.mubr.f32.mxu1 %v4533_v10 }
  0x39   : > { %4322 = vmatmul.mubr.msk.f32.gmra.mrb[18].mxu1 %vm625_vm4, %v344_v57 }
  0x3a   : > { %763 = vmatprep.mubr.f32.mxu1 %v4533_v10 }
  0x3d   : > { %4323 = vmatmul.mubr.msk.f32.gmra.mrb[20].mxu1 %vm625_vm4, %v345_v58 }
  0x3e   : > { %769 = vmatprep.mubr.f32.mxu1 %v4533_v10 }
  0x41   : > { %4324 = vmatmul.mubr.msk.f32.gmra.mrb[22].mxu1 %vm625_vm4, %v346_v59 }
  0x42   : > { %775 = vmatprep.mubr.f32.mxu1 %v4533_v10 }
  0x45   : > { %4325 = vmatmul.mubr.msk.f32.gmra.mrb[24].mxu1 %vm625_vm4, %v347_v60 }
  0x46   : > { %781 = vmatprep.mubr.f32.mxu1 %v4533_v10 }
  0x49   : > { %4326 = vmatmul.mubr.msk.f32.gmra.mrb[26].mxu1 %vm625_vm4, %v348_v61 }
  0xe8   : > { %v4417_v8 = vpop.f32.mrb[0].mxu1 }
  0xe9   : > { %v4813_v9 = vadd.f32 %v4417_v8, %v4810_v7  ;;  %v559_v11 = vpop.f32.mrb[1].mxu1 }
  0xea   : > { %v4816_v12 = vadd.f32 %v4810_v7, %v559_v11  ;;  %v446_v13 = vpop.f32.mrb[0].mxu0 }
  0xeb   : > { %v448_v15 = vpop.f32.mrb[1].mxu0  ;;  %v614_v21 = vmax.f32 %v4813_v9, 0.0 }
  0xec   : > { %v613_v16 = vmax.f32 %v4816_v12, 0.0  ;;  %v4420_v17 = vpop.f32.mrb[2].mxu1  ;;  %v804_v18 = vcombine.low %v446_v13, %v448_v15  ;;  %v805_v19 = vcombine.high %v446_v13, %v448_v15  ;;  %v4327_v20 = vcombine.low %v448_v15, %v448_v15 }
  0xed   : > { %v4821_v22 = vadd.f32 %v4420_v17, %v4810_v7  ;;  %v569_v23 = vpop.f32.mrb[3].mxu1  ;;  %v4328_v26 = vcombine.high %v448_v15, %v448_v15 }
  0xee   : > { %v607_v27 = vadd.f32 %v4810_v7, %v569_v23  ;;  %4351 = vmatmul.mubr.msk.f32.vlgmr.msra.gmra.mrb[16].mxu0 %vm3106_vm5, %v613_v16  ;;  %v868_v28 = vsel %vm656_vm0, %v804_v18, 0.0  ;;  %v875_v29 = vsel %vm656_vm0, %v4327_v20, 0.0  ;;  %v882_v30 = vsel %vm656_vm0, %v805_v19, 0.0  ;;  %v4832_v31 = vpop.f32.mrb[2].mxu0 }
  0xef   : > { %v616_v32 = vmax.f32 %v4821_v22, 0.0  ;;  %3201 = vmatprep.mubr.f32.mxu0 %v4533_v10  ;;  %4488 = vmatpush3.bf16.msra.mxu0 %v4710_v44  ;;  %v869_v33 = vrot.slane %v868_v28, 4  ;;  %v876_v34 = vrot.slane %v875_v29, 4  ;;  %v883_v35 = vrot.slane %v882_v30, 4  ;;  %v4837_v36 = vpop.f32.mrb[3].mxu0 }
  0xf0   : > { %v615_v37 = vmax.f32 %v607_v27, 0.0  ;;  %v4423_v38 = vpop.f32.mrb[4].mxu1  ;;  %4490 = vmatprep.subr.bf16.mxu0 %v4783_v0  ;;  %v889_v39 = vsel %vm656_vm0, %v4328_v26, 0.0  ;;  %v806_v40 = vcombine.low %v4832_v31, %v4837_v36  ;;  %v807_v41 = vcombine.high %v4832_v31, %v4837_v36 }
  0xf1   : > { %v4846_v42 = vadd.f32 %v4423_v38, %v4810_v7  ;;  %v579_v43 = vpop.f32.mrb[5].mxu1  ;;  %v870_v44 = vadd.f32 %v869_v33, %v868_v28  ;;  %v877_v45 = vadd.f32 %v876_v34, %v875_v29  ;;  %v884_v46 = vadd.f32 %v883_v35, %v882_v30 }
  0xf2   : > { %4352 = vmatmul.mubr.msk.f32.gmra.mrb[18].mxu0 %vm3106_vm5, %v614_v21  ;;  %4446 = vmatprep.mubr.msk.f32.mxu1 %vm3106_vm5, %v615_v37  ;;  %v4853_v47 = vadd.f32 %v4810_v7, %v579_v43  ;;  %v890_v49 = vrot.slane %v889_v39, 4  ;;  %v4329_v50 = vcombine.low %v4837_v36, %v4837_v36  ;;  %v4860_v51 = vpop.f32.mrb[4].mxu0  ;;  %v896_v61 = vsel %vm656_vm0, %v806_v40, 0.0 }
  0xf3   : > { %4447 = vmatmul.mubr.msk.f32.vlgmr.msra.gmra.mrb[28].mxu1 %vm3106_vm5, %v616_v32  ;;  %v618_v52 = vmax.f32 %v4846_v42, 0.0  ;;  %3207 = vmatprep.mubr.f32.mxu0 %v4533_v10  ;;  %v871_v54 = vrot.slane %v870_v44, 2  ;;  %v878_v55 = vrot.slane %v877_v45, 2  ;;  %v4868_v56 = vpop.f32.mrb[5].mxu0  ;;  %v885_v59 = vrot.slane %v884_v46, 2 }
  0xf4   : > { %v617_v57 = vmax.f32 %v4853_v47, 0.0  ;;  %v4426_v58 = vpop.f32.mrb[6].mxu1  ;;  %4492 = vmatpush3.bf16.msra.mxu0 %v4783_v0  ;;  %v891_v60 = vadd.f32 %v890_v49, %v889_v39  ;;  %v903_v4 = vsel %vm656_vm0, %v4329_v50, 0.0  ;;  %v897_v13 = vrot.slane %v896_v61, 4 }
  0xf5   : > { %v4874_v62 = vadd.f32 %v4426_v58, %v4810_v7  ;;  %v589_v63 = vpop.f32.mrb[7].mxu1  ;;  %4494 = vmatprep.subr.bf16.mxu0 %v4793_v3  ;;  %v872_v1 = vadd.f32 %v871_v54, %v870_v44  ;;  %v879_v2 = vadd.f32 %v878_v55, %v877_v45  ;;  %v4895_v18 = vadd.f32 %v885_v59, %v884_v46 }
  0xf6   : > { %4353 = vmatmul.mubr.msk.f32.gmra.mrb[20].mxu0 %vm3106_vm5, %v615_v37  ;;  %4449 = vmatprep.mubr.msk.f32.mxu1 %vm3106_vm5, %v617_v57  ;;  %v4881_v0 = vadd.f32 %v4810_v7, %v589_v63  ;;  %v4883_v5 = vpop.f32.mrb[6].mxu0  ;;  %v892_v11 = vrot.slane %v891_v60, 2  ;;  %v4893_v7 = vsub.s32 %v1116_v53, %v4856_v48  ;;  %v904_v19 = vrot.slane %v903_v4, 4 }
  0xf7   : > { %3213 = vmatprep.mubr.f32.mxu0 %v4533_v10  ;;  %4450 = vmatmul.mubr.msk.f32.gmra.mrb[30].mxu1 %vm3106_vm5, %v618_v52  ;;  %v620_v8 = vmax.f32 %v4874_v62, 0.0  ;;  %v873_v23 = vrot.slane %v872_v1, 1  ;;  %v880_v24 = vrot.slane %v879_v2, 1  ;;  %v4330_v26 = vcombine.high %v4837_v36, %v4837_v36 }
  0xf8   : > { %v619_v15 = vmax.f32 %v4881_v0, 0.0  ;;  %4496 = vmatpush3.bf16.msra.mxu0 %v4793_v3  ;;  %v729_v17 = vpop.f32.mrb[8].mxu1  ;;  %v4910_v27 = vadd.f32 %v892_v11, %v891_v60  ;;  %v4912_v22 = vadd.f32 %v897_v13, %v896_v61  ;;  %v887_v33 = vrot.slane %v4895_v18, 1 }
  0xf9   : > { %4498 = vmatprep.subr.bf16.mxu0 %v4803_v6  ;;  %v731_v20 = vpop.f32.mrb[9].mxu1  ;;  %v4920_v34 = vadd.f32 %v904_v19, %v903_v4  ;;  %v4922_v37 = vadd.f32 %v873_v23, %v872_v1  ;;  %v4924_v38 = vadd.f32 %v880_v24, %v879_v2  ;;  %v4930_v39 = vsel %vm656_vm0, %v807_v41, 0.0 }
  0xfa   : > { %4354 = vmatmul.mubr.msk.f32.gmra.mrb[22].mxu0 %vm3106_vm5, %v616_v32  ;;  %4452 = vmatprep.mubr.msk.f32.mxu1 %vm3106_vm5, %v619_v15  ;;  %v1112_v3 = vcombine.low %v729_v17, %v731_v20  ;;  %v1113_v25 = vcombine.high %v729_v17, %v731_v20  ;;  %v894_v31 = vrot.slane %v4910_v27, 1  ;;  %v899_v41 = vrot.slane %v4912_v22, 2  ;;  %v4956_v20 = vpop.f32.mrb[7].mxu0 }
  0xfb   : > { %3219 = vmatprep.mubr.f32.mxu0 %v4533_v10  ;;  %4453 = vmatmul.mubr.msk.f32.gmra.mrb[32].mxu1 %vm3106_vm5, %v620_v8  ;;  %6578 = vst [vmem:[#allocation2_spill] sm:$0xff] %v4922_v37  ;;  %6579 = vst [vmem:[#allocation3_spill] sm:$0xff] %v4924_v38  ;;  %v906_v60 = vrot.slane %v4920_v34, 2  ;;  %v911_v61 = vrot.slane %v4930_v39, 4  ;;  %v5012_v12 = vsel %vm656_vm0, %v4330_v26, 0.0 }
  0xfc   : > { %4500 = vmatpush3.bf16.msra.mxu0 %v4803_v6  ;;  %v1120_v29 = vrot.slane %v1112_v3, %v4893_v7  ;;  %v1127_v30 = vrot.slane %v1113_v25, %v4893_v7  ;;  %v735_v32 = vpop.f32.mrb[10].mxu1 }
  0xfd   : > { %v737_v35 = vpop.f32.mrb[11].mxu1  ;;  %v5033_v9 = vadd.f32 %v906_v60, %v4920_v34  ;;  %v5048_v34 = vadd.f32 %v887_v33, %v4895_v18 }
  0xfe   : > { %4355 = vmatmul.mubr.msk.f32.gmra.mrb[24].mxu0 %vm3106_vm5, %v617_v57  ;;  %v1128_v40 = vcombine.high %v1120_v29, %v1120_v29  ;;  %v1129_v43 = vcombine.high %v1127_v30, %v1127_v30  ;;  %v1136_v44 = vrot.slane %v1120_v29, %v4893_v7  ;;  %v1143_v45 = vrot.slane %v1127_v30, %v4893_v7 }
  0xff   : > { %3225 = vmatprep.mubr.f32.mxu0 %v4533_v10  ;;  %v1162_v46 = vcombine.low %v735_v32, %v737_v35  ;;  %v1163_v47 = vcombine.high %v735_v32, %v737_v35  ;;  %6580 = vst [vmem:[#allocation4_spill] sm:$0xff] %v5048_v34  ;;  %v908_v33 = vrot.slane %v5033_v9, 1 }
 0x100   : > { %v1150_v49 = vrot.slane %v1128_v40, %v4893_v7  ;;  %v1157_v50 = vrot.slane %v1129_v43, %v4893_v7  ;;  %v1159_v53 = vcombine.high %v1143_v45, %v1143_v45  ;;  %v1634_v54 = vrot.slane %v1143_v45, %v4893_v7  ;;  %v4943_v55 = vpop.f32.mrb[12].mxu1 }
 0x101   : > { %v1170_v57 = vrot.slane %v1162_v46, %v4893_v7  ;;  %v1177_v58 = vrot.slane %v1163_v47, %v4893_v7  ;;  %v4947_v59 = vpop.f32.mrb[13].mxu1 }
 0x102   : > { %4356 = vmatmul.mubr.msk.f32.gmra.mrb[26].mxu0 %vm3106_vm5, %v618_v52  ;;  %v1612_v63 = vcombine.low %v1136_v44, %v1150_v49  ;;  %v4343_v1 = vcombine.high %v1136_v44, %v1150_v49  ;;  %v1637_v2 = vcombine.high %v1634_v54, %v1634_v54  ;;  %v1658_v4 = vrot.slane %v1634_v54, %v4893_v7 }
 0x103   : > { %3231 = vmatprep.mubr.f32.mxu0 %v4533_v10  ;;  %v1668_v11 = vcombine.low %v1157_v50, %v1159_v53  ;;  %v1161_v13 = vcombine.high %v1157_v50, %v1157_v50  ;;  %v1178_v17 = vcombine.high %v1170_v57, %v1170_v57  ;;  %v1179_v19 = vcombine.high %v1177_v58, %v1177_v58 }
 0x104   : > { %v1620_v23 = vrot.slane %v1612_v63, %v4893_v7  ;;  %v1627_v24 = vrot.slane %v4343_v1, %v4893_v7  ;;  %v1665_v42 = vrot.slane %v1637_v2, %v4893_v7  ;;  %v1186_v52 = vrot.slane %v1170_v57, %v4893_v7  ;;  %v4962_v3 = vpop.f32.mrb[14].mxu1 }
 0x105   : > { %v1676_v25 = vrot.slane %v1668_v11, %v4893_v7  ;;  %v1193_v29 = vrot.slane %v1177_v58, %v4893_v7  ;;  %v1200_v30 = vrot.slane %v1178_v17, %v4893_v7  ;;  %v4968_v32 = vrot.slane %v1179_v19, %v4893_v7  ;;  %v4970_v35 = vpop.f32.mrb[15].mxu1 }
 0x106   : > { %4357 = vmatmul.mubr.msk.f32.gmra.mrb[28].mxu0 %vm3106_vm5, %v619_v15  ;;  %v1635_v40 = vcombine.low %v1620_v23, %v1627_v24  ;;  %v1636_v43 = vcombine.high %v1620_v23, %v1627_v24  ;;  %v1669_v44 = vcombine.low %v1161_v13, %v1186_v52  ;;  %v1212_v45 = vcombine.low %v4943_v55, %v4947_v59  ;;  %v4994_v23 = vpop.f32.mrb[8].mxu0 }
 0x107   : > { %3237 = vmatprep.mubr.f32.mxu0 %v4533_v10  ;;  %v1209_v46 = vcombine.high %v1193_v29, %v1193_v29  ;;  %v1690_v47 = vrot.slane %v1200_v30, %v4893_v7  ;;  %v4344_v49 = vcombine.high %v1186_v52, %v1200_v30  ;;  %v1725_v50 = vcombine.low %v1193_v29, %v4968_v32  ;;  %v5001_v29 = vpop.f32.mrb[9].mxu0 }
 0x108   : > { %v1644_v53 = vrot.slane %v1635_v40, %v4893_v7  ;;  %v1651_v0 = vrot.slane %v1636_v43, %v4893_v7  ;;  %v1683_v15 = vrot.slane %v1669_v44, %v4893_v7  ;;  %v4983_v54 = vpop.f32.mrb[16].mxu1  ;;  %v900_v57 = vadd.f32 %v899_v41, %v4912_v22 }
 0x109   : > { %v1693_v58 = vcombine.high %v1690_v47, %v1690_v47  ;;  %v1714_v63 = vrot.slane %v1690_v47, %v4893_v7  ;;  %v1732_v10 = vrot.slane %v4344_v49, %v4893_v7  ;;  %v1739_v1 = vrot.slane %v1725_v50, %v4893_v7  ;;  %v4989_v2 = vpop.f32.mrb[17].mxu1 }
 0x10a   : > { %4358 = vmatmul.mubr.msk.f32.gmra.mrb[30].mxu0 %vm3106_vm5, %v620_v8  ;;  %v1666_v11 = vcombine.low %v1644_v53, %v1658_v4  ;;  %v1667_v13 = vcombine.low %v1651_v0, %v1665_v42  ;;  %v1691_v17 = vcombine.low %v1676_v25, %v1683_v15  ;;  %v1692_v19 = vcombine.high %v1676_v25, %v1683_v15 }
 0x10b   : > { %4443 = vmatprep.mubr.msk.f32.mxu0 %vm3106_vm5, %v613_v16  ;;  %v1721_v22 = vrot.slane %v1693_v58, %v4893_v7  ;;  %v1746_v41 = vrot.slane %v1209_v46, %v4893_v7  ;;  %v1747_v24 = vcombine.low %v1732_v10, %v1739_v1  ;;  %v1748_v52 = vcombine.high %v1732_v10, %v1739_v1 }
 0x10c   : > { %v2541_v62 = vsel %vm2540_vm6, %v1666_v11, 0.0  ;;  %v1700_v8 = vrot.slane %v1691_v17, %v4893_v7  ;;  %v1707_v4 = vrot.slane %v1692_v19, %v4893_v7  ;;  %v5006_v42 = vpop.f32.mrb[18].mxu1  ;;  %v2548_v25 = vsel %vm2540_vm6, %v1667_v13, 0.0 }
 0x10d   : > { %v2542_v16 = vrot.slane %v2541_v62, 4  ;;  %v1749_v30 = vcombine.high %v1746_v41, %v1746_v41  ;;  %v1756_v40 = vrot.slane %v1747_v24, %v4893_v7  ;;  %v5016_v43 = vpop.f32.mrb[19].mxu1  ;;  %v5022_v47 = vrot.slane %v1748_v52, %v4893_v7 }
 0x10e   : > { %4444 = vmatmul.mubr.msk.f32.vlgmr.msra.gmra.mrb[32].mxu0 %vm3106_vm5, %v614_v21  ;;  %v1722_v44 = vcombine.low %v1700_v8, %v1714_v63  ;;  %v1723_v46 = vcombine.low %v1707_v4, %v1721_v22  ;;  %v1770_v36 = vrot.slane %v1746_v41, %v4893_v7  ;;  %v1213_v49 = vcombine.high %v4943_v55, %v4947_v59  ;;  %v5039_v63 = vpop.f32.mrb[10].mxu0 }
 0x10f   : > { %v5026_v26 = vrot.slane %v1749_v30, %v4893_v7  ;;  %v901_v50 = vrot.slane %v900_v57, 1  ;;  %v2549_v21 = vrot.slane %v2548_v25, 4  ;;  %v1220_v15 = vrot.slane %v1212_v45, %v4893_v7  ;;  %v5057_v45 = vpop.f32.mrb[11].mxu0 }
 0x110   : > { %v1778_v53 = vcombine.low %v1756_v40, %v1770_v36  ;;  %v2555_v0 = vsel %vm2540_vm6, %v1722_v44, 0.0  ;;  %v5037_v58 = vpop.f32.mrb[20].mxu1  ;;  %v5041_v10 = vadd.f32 %v2542_v16, %v2541_v62  ;;  %v5053_v59 = vadd.f32 %v894_v31, %v4910_v27 }
 0x111   : > { %v1779_v55 = vcombine.low %v5022_v47, %v5026_v26  ;;  %v5055_v60 = vpop.f32.mrb[21].mxu1  ;;  %v5060_v1 = vsel %vm2540_vm6, %v1723_v46, 0.0  ;;  %v1211_v11 = vcombine.high %v4968_v32, %v4968_v32  ;;  %v1227_v13 = vrot.slane %v1213_v49, %v4893_v7 }
 0x112   : > { %6581 = vst [vmem:[#allocation5_spill] sm:$0xff] %v5053_v59  ;;  %v1228_v17 = vcombine.high %v1220_v15, %v1220_v15  ;;  %v2556_v18 = vrot.slane %v2555_v0, 4  ;;  %v5069_v27 = vadd.f32 %v911_v61, %v4930_v39  ;;  %v5072_v19 = vadd.f32 %v2549_v21, %v2548_v25  ;;  %v5098_v21 = vpop.f32.mrb[12].mxu0 }
 0x113   : > { %v1229_v22 = vcombine.high %v1227_v13, %v1227_v13  ;;  %v1236_v41 = vrot.slane %v1220_v15, %v4893_v7  ;;  %v5075_v24 = vadd.f32 %v901_v50, %v900_v57  ;;  %v2544_v52 = vrot.slane %v5041_v10, 2 }
 0x114   : > { %v5077_v32 = vpop.f32.mrb[22].mxu1  ;;  %v1243_v8 = vrot.slane %v1227_v13, %v4893_v7  ;;  %v1250_v39 = vrot.slane %v1228_v17, %v4893_v7  ;;  %v5086_v4 = vsel %vm2540_vm6, %v1778_v53, 0.0  ;;  %v5089_v30 = vadd.f32 %v2556_v18, %v2555_v0 }
 0x115   : > { %6582 = vst [vmem:[#allocation6_spill] sm:$0xff] %v5075_v24  ;;  %v5083_v61 = vpop.f32.mrb[23].mxu1  ;;  %v1257_v16 = vrot.slane %v1229_v22, %v4893_v7  ;;  %v1258_v25 = vcombine.high %v1236_v41, %v1236_v41  ;;  %v1780_v57 = vcombine.low %v1211_v11, %v1236_v41  ;;  %v1262_v44 = vcombine.low %v4962_v3, %v4970_v35 }
 0x116   : > { %v1260_v40 = vcombine.high %v1250_v39, %v1250_v39  ;;  %v1263_v46 = vcombine.high %v4962_v3, %v4970_v35  ;;  %v1312_v11 = vcombine.low %v4983_v54, %v4989_v2  ;;  %v5107_v3 = vpop.f32.mrb[13].mxu0  ;;  %v1313_v22 = vcombine.high %v4983_v54, %v4989_v2 }
 0x117   : > { %v1781_v47 = vcombine.low %v1250_v39, %v1258_v25  ;;  %v1788_v36 = vrot.slane %v1780_v57, %v4893_v7  ;;  %v1836_v26 = vcombine.low %v1243_v8, %v1257_v16  ;;  %v4345_v49 = vcombine.high %v1243_v8, %v1257_v16  ;;  %v5135_v62 = vpop.f32.mrb[14].mxu0 }
 0x118   : > { %v5096_v50 = vpop.f32.mrb[24].mxu1  ;;  %v1802_v53 = vrot.slane %v1260_v40, %v4893_v7  ;;  %v1270_v0 = vrot.slane %v1262_v44, %v4893_v7  ;;  %v1277_v15 = vrot.slane %v1263_v46, %v4893_v7 }
 0x119   : > { %v5105_v13 = vpop.f32.mrb[25].mxu1  ;;  %v1795_v35 = vrot.slane %v1781_v47, %v4893_v7  ;;  %v1844_v17 = vrot.slane %v1836_v26, %v4893_v7  ;;  %v1851_v18 = vrot.slane %v4345_v49, %v4893_v7 }
 0x11a   : > { %v1805_v41 = vcombine.high %v1802_v53, %v1802_v53  ;;  %v1826_v8 = vrot.slane %v1802_v53, %v4893_v7  ;;  %v1278_v39 = vcombine.high %v1270_v0, %v1270_v0  ;;  %v1279_v16 = vcombine.high %v1277_v15, %v1277_v15 }
 0x11b   : > { %v1803_v25 = vcombine.low %v1788_v36, %v1795_v35  ;;  %v1804_v57 = vcombine.high %v1788_v36, %v1795_v35  ;;  %v1859_v40 = vcombine.low %v1844_v17, %v1851_v18  ;;  %v1860_v44 = vcombine.high %v1844_v17, %v1851_v18 }
 0x11c   : > { %v5115_v46 = vpop.f32.mrb[26].mxu1  ;;  %v1833_v47 = vrot.slane %v1805_v41, %v4893_v7  ;;  %v1286_v26 = vrot.slane %v1270_v0, %v4893_v7  ;;  %v5120_v49 = vrot.slane %v1277_v15, %v4893_v7  ;;  %v1300_v54 = vrot.slane %v1278_v39, %v4893_v7 }
 0x11d   : > { %v5123_v2 = vpop.f32.mrb[27].mxu1  ;;  %v2576_v53 = vsel %vm2540_vm6, %v1779_v55, 0.0  ;;  %v1812_v14 = vrot.slane %v1803_v25, %v4893_v7  ;;  %v1819_v36 = vrot.slane %v1804_v57, %v4893_v7  ;;  %v1307_v35 = vrot.slane %v1279_v16, %v4893_v7 }
 0x11e   : > { %v1308_v17 = vcombine.high %v1286_v26, %v1286_v26  ;;  %v1310_v18 = vcombine.high %v1300_v54, %v1300_v54  ;;  %v1858_v41 = vrot.slane %v1286_v26, %v4893_v7  ;;  %v1868_v0 = vrot.slane %v1859_v40, %v4893_v7 }
 0x11f   : > { %v1834_v15 = vcombine.low %v1812_v14, %v1826_v8  ;;  %v1835_v6 = vcombine.low %v1819_v36, %v1833_v47  ;;  %v1875_v39 = vrot.slane %v1860_v44, %v4893_v7  ;;  %v1914_v28 = vrot.slane %v1307_v35, %v4893_v7  ;;  %v5146_v8 = vpop.f32.mrb[15].mxu0 }
 0x120   : > { %v1861_v31 = vcombine.high %v1858_v41, %v1858_v41  ;;  %v1882_v55 = vrot.slane %v1858_v41, %v4893_v7  ;;  %v1892_v25 = vcombine.low %v1300_v54, %v1308_v17  ;;  %v1893_v57 = vcombine.low %v1310_v18, %v5120_v49 }
 0x121   : > { %v5138_v16 = vadd.f32 %v2544_v52, %v5041_v10  ;;  %v1917_v40 = vcombine.high %v1914_v28, %v1914_v28  ;;  %v5144_v14 = vadd.f32 %v908_v33, %v5033_v9  ;;  %v6584_v44 = vrot.slane %v5060_v1, 4 }
 0x122   : > { %v2570_v54 = vrot.slane %v5086_v4, 4  ;;  %v1889_v10 = vrot.slane %v1861_v31, %v4893_v7  ;;  %v1890_v52 = vcombine.low %v1868_v0, %v1882_v55  ;;  %v2577_v17 = vrot.slane %v2576_v53, 4 }
 0x123   : > { %6583 = vst [vmem:[#allocation7_spill] sm:$0xff] %v5144_v14  ;;  %v5151_v47 = vadd.f32 %v6584_v44, %v5060_v1  ;;  %v1900_v18 = vrot.slane %v1892_v25, %v4893_v7  ;;  %v1907_v9 = vrot.slane %v1893_v57, %v4893_v7  ;;  %v1938_v41 = vrot.slane %v1914_v28, %v4893_v7 }
 0x124   : > { %v1891_v33 = vcombine.low %v1875_v39, %v1889_v10  ;;  %v1945_v26 = vrot.slane %v1917_v40, %v4893_v7  ;;  %v2597_v1 = vsel %vm2540_vm6, %v1890_v52, 0.0  ;;  %v1320_v31 = vrot.slane %v1312_v11, %v4893_v7 }
 0x125   : > { %v1915_v44 = vcombine.low %v1900_v18, %v1907_v9  ;;  %v1916_v14 = vcombine.high %v1900_v18, %v1907_v9  ;;  %v2598_v24 = vrot.slane %v2597_v1, 4  ;;  %v4346_v0 = vcombine.high %v5120_v49, %v1307_v35 }
 0x126   : > { %v1327_v55 = vrot.slane %v1313_v22, %v4893_v7  ;;  %v1362_v25 = vcombine.low %v5006_v42, %v5016_v43  ;;  %v1363_v39 = vcombine.high %v5006_v42, %v5016_v43  ;;  %v5169_v28 = vsel %vm2540_vm6, %v1834_v15, 0.0 }
 0x127   : > { %v5172_v57 = vsel %vm2540_vm6, %v1835_v6, 0.0  ;;  %v1924_v40 = vrot.slane %v1915_v44, %v4893_v7  ;;  %v1931_v11 = vrot.slane %v1916_v14, %v4893_v7  ;;  %v1328_v10 = vcombine.high %v1320_v31, %v1320_v31 }
 0x128   : > { %v1329_v49 = vcombine.high %v1327_v55, %v1327_v55  ;;  %v1336_v22 = vrot.slane %v1320_v31, %v4893_v7  ;;  %v1343_v35 = vrot.slane %v1327_v55, %v4893_v7  ;;  %v2599_v9 = vadd.f32 %v2598_v24, %v2597_v1 }
 0x129   : > { %v1946_v52 = vcombine.low %v1924_v40, %v1938_v41  ;;  %v1947_v18 = vcombine.low %v1931_v11, %v1945_v26  ;;  %v2604_v42 = vsel %vm2540_vm6, %v1891_v33, 0.0  ;;  %v1350_v43 = vrot.slane %v1328_v10, %v4893_v7 }
 0x12a   : > { %v1357_v6 = vrot.slane %v1329_v49, %v4893_v7  ;;  %v1358_v15 = vcombine.high %v1336_v22, %v1336_v22  ;;  %v1359_v36 = vcombine.high %v1343_v35, %v1343_v35  ;;  %v5182_v44 = vadd.f32 %v2570_v54, %v5086_v4 }
 0x12b   : > { %v5184_v14 = vadd.f32 %v2577_v17, %v2576_v53  ;;  %v2584_v31 = vrot.slane %v5169_v28, 4  ;;  %v2591_v55 = vrot.slane %v5172_v57, 4  ;;  %v1956_v26 = vrot.slane %v4346_v0, %v4893_v7 }
 0x12c   : > { %v2605_v24 = vrot.slane %v2604_v42, 4  ;;  %v1360_v41 = vcombine.high %v1350_v43, %v1350_v43  ;;  %v1361_v33 = vcombine.high %v1357_v6, %v1357_v6  ;;  %v2611_v1 = vsel %vm2540_vm6, %v1946_v52, 0.0 }
 0x12d   : > { %6585 = vst [vmem:[#allocation8_spill] sm:$0xff] %v5184_v14  ;;  %v1949_v40 = vcombine.low %v1336_v22, %v1350_v43  ;;  %v1970_v11 = vrot.slane %v1358_v15, %v4893_v7  ;;  %v2005_v10 = vcombine.low %v1357_v6, %v1359_v36  ;;  %v2600_v49 = vrot.slane %v2599_v9, 2 }
 0x12e   : > { %v2004_v4 = vcombine.low %v1360_v41, %v1343_v35  ;;  %v2026_v53 = vrot.slane %v1361_v33, %v4893_v7  ;;  %v1370_v54 = vrot.slane %v1362_v25, %v4893_v7  ;;  %v2618_v17 = vsel %vm2540_vm6, %v1947_v18, 0.0 }
 0x12f   : > { %v1963_v14 = vrot.slane %v1949_v40, %v4893_v7  ;;  %v1973_v0 = vcombine.high %v1970_v11, %v1970_v11  ;;  %v2019_v59 = vrot.slane %v2005_v10, %v4893_v7  ;;  %v2612_v34 = vrot.slane %v2611_v1, 4 }
 0x130   : > { %v1994_v52 = vrot.slane %v1970_v11, %v4893_v7  ;;  %v2012_v22 = vrot.slane %v2004_v4, %v4893_v7  ;;  %v2029_v43 = vcombine.high %v2026_v53, %v2026_v53  ;;  %v2050_v15 = vrot.slane %v2026_v53, %v4893_v7 }
 0x131   : > { %v1971_v36 = vcombine.low %v1956_v26, %v1963_v14  ;;  %v1972_v6 = vcombine.high %v1956_v26, %v1963_v14  ;;  %v2001_v35 = vrot.slane %v1973_v0, %v4893_v7  ;;  %v1378_v33 = vcombine.high %v1370_v54, %v1370_v54 }
 0x132   : > { %v2027_v25 = vcombine.low %v2012_v22, %v2019_v59  ;;  %v2028_v41 = vcombine.high %v2012_v22, %v2019_v59  ;;  %v2057_v18 = vrot.slane %v2029_v43, %v4893_v7  ;;  %v1377_v11 = vrot.slane %v1363_v39, %v4893_v7 }
 0x133   : > { %v1980_v40 = vrot.slane %v1971_v36, %v4893_v7  ;;  %v1987_v10 = vrot.slane %v1972_v6, %v4893_v7  ;;  %v1386_v4 = vrot.slane %v1370_v54, %v4893_v7  ;;  %v5205_v38 = vadd.f32 %v2605_v24, %v2604_v42 }
 0x134   : > { %v2036_v14 = vrot.slane %v2027_v25, %v4893_v7  ;;  %v2043_v26 = vrot.slane %v2028_v41, %v4893_v7  ;;  %v1400_v53 = vrot.slane %v1378_v33, %v4893_v7  ;;  %v2619_v59 = vrot.slane %v2618_v17, 4 }
 0x135   : > { %6586 = vst [vmem:[#allocation9_spill] sm:$0xff] %v5205_v38  ;;  %v2002_v0 = vcombine.low %v1980_v40, %v1994_v52  ;;  %v2003_v22 = vcombine.low %v1987_v10, %v2001_v35  ;;  %v1393_v43 = vrot.slane %v1377_v11, %v4893_v7  ;;  %v5211_v36 = vadd.f32 %v2612_v34, %v2611_v1 }
 0x136   : > { %v2058_v6 = vcombine.low %v2036_v14, %v2050_v15  ;;  %v2059_v37 = vcombine.low %v2043_v26, %v2057_v18  ;;  %v2060_v39 = vcombine.low %v1386_v4, %v1400_v53  ;;  %v1379_v42 = vcombine.high %v1377_v11, %v1377_v11 }
 0x137   : > { %6587 = vst [vmem:[#allocation10_spill] sm:$0xff] %v5211_v36  ;;  %v4347_v24 = vcombine.high %v1386_v4, %v1400_v53  ;;  %v2082_v25 = vrot.slane %v1393_v43, %v4893_v7  ;;  %v5216_v41 = vadd.f32 %v2584_v31, %v5169_v28  ;;  %v5219_v33 = vadd.f32 %v2591_v55, %v5172_v57 }
 0x138   : > { %v5221_v52 = vadd.f32 %v2600_v49, %v2599_v9  ;;  %v2625_v1 = vsel %vm2540_vm6, %v2002_v0, 0.0  ;;  %v5226_v35 = vsel %vm2540_vm6, %v2003_v22, 0.0  ;;  %v2068_v15 = vrot.slane %v2060_v39, %v4893_v7 }
 0x139   : > { %6588 = vst [vmem:[#allocation11_spill] sm:$0xff] %v5216_v41  ;;  %6589 = vst [vmem:[#allocation12_spill] sm:$0xff] %v5219_v33  ;;  %v2075_v18 = vrot.slane %v4347_v24, %v4893_v7  ;;  %v5231_v28 = vadd.f32 %v2619_v59, %v2618_v17  ;;  %v1409_v31 = vcombine.high %v1393_v43, %v1393_v43  ;;  %v2626_v11 = vrot.slane %v2625_v1, 4 }
 0x13a   : > { %6590 = vst [vmem:[#allocation13_spill] sm:$0xff] %v5221_v52  ;;  %v2085_v57 = vcombine.high %v2082_v25, %v2082_v25  ;;  %v1407_v9 = vrot.slane %v1379_v42, %v4893_v7  ;;  %v2106_v10 = vrot.slane %v2082_v25, %v4893_v7  ;;  %v913_v26 = vrot.slane %v5069_v27, 2 }
 0x13b   : > { %6591 = vst [vmem:[#allocation14_spill] sm:$0xff] %v5231_v28  ;;  %v2083_v55 = vcombine.low %v2068_v15, %v2075_v18  ;;  %v2084_v49 = vcombine.high %v2068_v15, %v2075_v18  ;;  %v5239_v53 = vsel %vm2540_vm6, %v2058_v6, 0.0  ;;  %v6592_v0 = vrot.slane %v5012_v12, 4 }
 0x13c   : > { %v2113_v14 = vrot.slane %v2085_v57, %v4893_v7  ;;  %v5247_v43 = vsel %vm2540_vm6, %v2059_v37, 0.0  ;;  %v2116_v39 = vcombine.low %v1407_v9, %v1409_v31  ;;  %v1412_v42 = vcombine.low %v5037_v58, %v5055_v60 }
 0x13d   : > { %v2092_v17 = vrot.slane %v2083_v55, %v4893_v7  ;;  %v2099_v59 = vrot.slane %v2084_v49, %v4893_v7  ;;  %v919_v22 = vadd.f32 %v6592_v0, %v5012_v12  ;;  %v1413_v24 = vcombine.high %v5037_v58, %v5055_v60 }
 0x13e   : > { %v1462_v18 = vcombine.low %v5077_v32, %v5083_v61  ;;  %v5256_v57 = vadd.f32 %v913_v26, %v5069_v27  ;;  %v1420_v12 = vrot.slane %v1412_v42, %v4893_v7  ;;  %v1463_v31 = vcombine.high %v5077_v32, %v5083_v61 }
 0x13f   : > { %v2114_v6 = vcombine.low %v2092_v17, %v2106_v10  ;;  %v2115_v25 = vcombine.low %v2099_v59, %v2113_v14  ;;  %v920_v15 = vrot.slane %v919_v22, 2  ;;  %v1427_v37 = vrot.slane %v1413_v24, %v4893_v7 }
 0x140   : > { %v2640_v55 = vrot.slane %v5239_v53, 4  ;;  %v2647_v58 = vrot.slane %v5247_v43, 4  ;;  %v1411_v49 = vcombine.high %v1407_v9, %v1407_v9  ;;  %v1428_v27 = vcombine.high %v1420_v12, %v1420_v12 }
 0x141   : > { %v2653_v60 = vsel %vm2540_vm6, %v2114_v6, 0.0  ;;  %v2660_v10 = vsel %vm2540_vm6, %v2115_v25, 0.0  ;;  %v5266_v14 = vadd.f32 %v920_v15, %v919_v22  ;;  %v1429_v26 = vcombine.high %v1427_v37, %v1427_v37 }
 0x142   : > { %v5268_v17 = vadd.f32 %v2626_v11, %v2625_v1  ;;  %v1436_v59 = vrot.slane %v1420_v12, %v4893_v7  ;;  %v1443_v0 = vrot.slane %v1427_v37, %v4893_v7  ;;  %v1470_v32 = vrot.slane %v1462_v18, %v4893_v7 }
 0x143   : > { %v2124_v61 = vrot.slane %v2116_v39, %v4893_v7  ;;  %v915_v42 = vrot.slane %v5256_v57, 1  ;;  %v1450_v9 = vrot.slane %v1428_v27, %v4893_v7  ;;  %v1457_v24 = vrot.slane %v1429_v26, %v4893_v7 }
 0x144   : > { %v2654_v22 = vrot.slane %v2653_v60, 4  ;;  %v2661_v6 = vrot.slane %v2660_v10, 4  ;;  %v1459_v25 = vcombine.high %v1443_v0, %v1443_v0  ;;  %v2117_v15 = vcombine.low %v1411_v49, %v1436_v59 }
 0x145   : > { %v922_v1 = vrot.slane %v5266_v14, 1  ;;  %v2138_v11 = vrot.slane %v1450_v9, %v4893_v7  ;;  %v4348_v12 = vcombine.high %v1436_v59, %v1450_v9  ;;  %v1477_v37 = vrot.slane %v1463_v31, %v4893_v7 }
 0x146   : > { %v2131_v18 = vrot.slane %v2117_v15, %v4893_v7  ;;  %v2173_v39 = vcombine.low %v1443_v0, %v1457_v24  ;;  %v2194_v40 = vrot.slane %v1459_v25, %v4893_v7  ;;  %v1478_v34 = vcombine.high %v1470_v32, %v1470_v32 }
 0x147   : > { %v2141_v27 = vcombine.high %v2138_v11, %v2138_v11  ;;  %v2162_v26 = vrot.slane %v2138_v11, %v4893_v7  ;;  %v2180_v54 = vrot.slane %v4348_v12, %v4893_v7  ;;  %v1461_v4 = vcombine.high %v1457_v24, %v1457_v24 }
 0x148   : > { %v2139_v49 = vcombine.low %v2124_v61, %v2131_v18  ;;  %v2140_v28 = vcombine.high %v2124_v61, %v2131_v18  ;;  %v2187_v36 = vrot.slane %v2173_v39, %v4893_v7  ;;  %v2197_v38 = vcombine.high %v2194_v40, %v2194_v40 }
 0x149   : > { %v2169_v59 = vrot.slane %v2141_v27, %v4893_v7  ;;  %v2218_v31 = vrot.slane %v2194_v40, %v4893_v7  ;;  %v1479_v9 = vcombine.high %v1477_v37, %v1477_v37  ;;  %v1486_v0 = vrot.slane %v1470_v32, %v4893_v7 }
 0x14a   : > { %v2148_v25 = vrot.slane %v2139_v49, %v4893_v7  ;;  %v2155_v15 = vrot.slane %v2140_v28, %v4893_v7  ;;  %v2195_v11 = vcombine.low %v2180_v54, %v2187_v36  ;;  %v2196_v52 = vcombine.high %v2180_v54, %v2187_v36 }
 0x14b   : > { %v2225_v24 = vrot.slane %v2197_v38, %v4893_v7  ;;  %v1493_v61 = vrot.slane %v1477_v37, %v4893_v7  ;;  %v1500_v12 = vrot.slane %v1478_v34, %v4893_v7  ;;  %v1507_v18 = vrot.slane %v1479_v9, %v4893_v7 }
 0x14c   : > { %v2170_v39 = vcombine.low %v2148_v25, %v2162_v26  ;;  %v2171_v27 = vcombine.low %v2155_v15, %v2169_v59  ;;  %v2204_v40 = vrot.slane %v2195_v11, %v4893_v7  ;;  %v2211_v32 = vrot.slane %v2196_v52, %v4893_v7 }
 0x14d   : > { %v2655_v33 = vadd.f32 %v2654_v22, %v2653_v60  ;;  %v1508_v49 = vcombine.high %v1486_v0, %v1486_v0  ;;  %v1510_v41 = vcombine.high %v1500_v12, %v1500_v12  ;;  %v2228_v28 = vcombine.low %v1461_v4, %v1486_v0 }
 0x14e   : > { %v6593_v36 = vrot.slane %v5226_v35, 4  ;;  %v5301_v54 = vadd.f32 %v2661_v6, %v2660_v10  ;;  %v2226_v34 = vcombine.low %v2204_v40, %v2218_v31  ;;  %v2227_v37 = vcombine.low %v2211_v32, %v2225_v24 }
 0x14f   : > { %v5304_v26 = vadd.f32 %v2640_v55, %v5239_v53  ;;  %v5307_v59 = vadd.f32 %v2647_v58, %v5247_v43  ;;  %v2229_v52 = vcombine.low %v1500_v12, %v1508_v49  ;;  %v2284_v60 = vcombine.low %v1493_v61, %v1507_v18 }
 0x150   : > { %v5299_v38 = vadd.f32 %v6593_v36, %v5226_v35  ;;  %v2667_v22 = vsel %vm2540_vm6, %v2170_v39, 0.0  ;;  %v2236_v4 = vrot.slane %v2228_v28, %v4893_v7  ;;  %v2250_v9 = vrot.slane %v1510_v41, %v4893_v7 }
 0x151   : > { %v4349_v35 = vcombine.high %v1493_v61, %v1507_v18  ;;  %v2656_v6 = vrot.slane %v2655_v33, 2  ;;  %v5314_v31 = vadd.f32 %v915_v42, %v5256_v57  ;;  %v5317_v53 = vadd.f32 %v922_v1, %v5266_v14 }
 0x152   : > { %v2674_v55 = vsel %vm2540_vm6, %v2171_v27, 0.0  ;;  %v2243_v58 = vrot.slane %v2229_v52, %v4893_v7  ;;  %v2253_v0 = vcombine.high %v2250_v9, %v2250_v9  ;;  %v2668_v25 = vrot.slane %v2667_v22, 4 }
 0x153   : > { %v2274_v41 = vrot.slane %v2250_v9, %v4893_v7  ;;  %v2292_v15 = vrot.slane %v2284_v60, %v4893_v7  ;;  %v2299_v11 = vrot.slane %v4349_v35, %v4893_v7  ;;  %v1512_v14 = vcombine.low %v5096_v50, %v5105_v13 }
 0x154   : > { %v2251_v24 = vcombine.low %v2236_v4, %v2243_v58  ;;  %v2252_v57 = vcombine.high %v2236_v4, %v2243_v58  ;;  %v2281_v42 = vrot.slane %v2253_v0, %v4893_v7  ;;  %v5328_v1 = vadd.f32 %v2656_v6, %v2655_v33 }
 0x155   : > { %v2675_v61 = vrot.slane %v2674_v55, 4  ;;  %v2681_v12 = vsel %vm2540_vm6, %v2226_v34, 0.0  ;;  %v1513_v18 = vcombine.high %v5096_v50, %v5105_v13  ;;  %v1520_v40 = vrot.slane %v1512_v14, %v4893_v7 }
 0x156   : > { %v2260_v39 = vrot.slane %v2251_v24, %v4893_v7  ;;  %v2267_v27 = vrot.slane %v2252_v57, %v4893_v7  ;;  %v4331_v32 = vcombine.low %v4868_v56, %v4868_v56  ;;  %v5338_v49 = vadd.f32 %v2668_v25, %v2667_v22 }
 0x157   : > { %v2688_v33 = vsel %vm2540_vm6, %v2227_v37, 0.0  ;;  %v2307_v28 = vcombine.low %v2292_v15, %v2299_v11  ;;  %v1527_v36 = vrot.slane %v1513_v18, %v4893_v7  ;;  %v1528_v60 = vcombine.high %v1520_v40, %v1520_v40 }
 0x158   : > { %v2282_v34 = vcombine.low %v2260_v39, %v2274_v41  ;;  %v2283_v52 = vcombine.low %v2267_v27, %v2281_v42  ;;  %v1536_v50 = vrot.slane %v1520_v40, %v4893_v7  ;;  %v2308_v13 = vcombine.high %v2292_v15, %v2299_v11 }
 0x159   : > { %v1529_v4 = vcombine.high %v1527_v36, %v1527_v36  ;;  %v6594_v9 = vcombine.low %v4860_v51, %v4868_v56  ;;  %v931_v22 = vsel %vm656_vm0, %v4331_v32, 0.0  ;;  %v2682_v6 = vrot.slane %v2681_v12, 4 }
 0x15a   : > { %v1543_v37 = vrot.slane %v1527_v36, %v4893_v7  ;;  %v1550_v58 = vrot.slane %v1528_v60, %v4893_v7  ;;  %v1558_v0 = vcombine.high %v1536_v50, %v1536_v50  ;;  %v5350_v25 = vadd.f32 %v2675_v61, %v2674_v55 }
 0x15b   : > { %v924_v35 = vsel %vm656_vm0, %v6594_v9, 0.0  ;;  %v1557_v41 = vrot.slane %v1529_v4, %v4893_v7  ;;  %v2306_v15 = vrot.slane %v1536_v50, %v4893_v7  ;;  %v2316_v11 = vrot.slane %v2307_v28, %v4893_v7 }
 0x15c   : > { %v1560_v24 = vcombine.high %v1550_v58, %v1550_v58  ;;  %v2340_v57 = vcombine.low %v1550_v58, %v1558_v0  ;;  %v925_v42 = vrot.slane %v924_v35, 4  ;;  %v932_v14 = vrot.slane %v931_v22, 4 }
 0x15d   : > { %v2689_v18 = vrot.slane %v2688_v33, 4  ;;  %v2323_v39 = vrot.slane %v2308_v13, %v4893_v7  ;;  %v2309_v27 = vcombine.high %v2306_v15, %v2306_v15  ;;  %v2330_v40 = vrot.slane %v2306_v15, %v4893_v7 }
 0x15e   : > { %v5357_v32 = vadd.f32 %v2682_v6, %v2681_v12  ;;  %v2341_v55 = vcombine.low %v1560_v24, %v1543_v37  ;;  %v2348_v61 = vrot.slane %v2340_v57, %v4893_v7  ;;  %v2362_v36 = vrot.slane %v1557_v41, %v4893_v7 }
 0x15f   : > { %v2337_v60 = vrot.slane %v2309_v27, %v4893_v7  ;;  %v2338_v28 = vcombine.low %v2316_v11, %v2330_v40  ;;  %v926_v50 = vadd.f32 %v925_v42, %v924_v35  ;;  %v933_v4 = vadd.f32 %v932_v14, %v931_v22 }
 0x160   : > { %6595 = vst [vmem:[#allocation15_spill] sm:$0xff] %v5357_v32  ;;  %v2695_v9 = vsel %vm2540_vm6, %v2282_v34, 0.0  ;;  %v2355_v58 = vrot.slane %v2341_v55, %v4893_v7  ;;  %v2365_v13 = vcombine.high %v2362_v36, %v2362_v36  ;;  %v4332_v0 = vcombine.high %v4868_v56, %v4868_v56 }
 0x161   : > { %v2702_v12 = vsel %vm2540_vm6, %v2283_v52, 0.0  ;;  %v2339_v6 = vcombine.low %v2323_v39, %v2337_v60  ;;  %v2709_v15 = vsel %vm2540_vm6, %v2338_v28, 0.0  ;;  %v927_v24 = vrot.slane %v926_v50, 2 }
 0x162   : > { %v2363_v57 = vcombine.low %v2348_v61, %v2355_v58  ;;  %v2364_v43 = vcombine.high %v2348_v61, %v2355_v58  ;;  %v2386_v11 = vrot.slane %v2362_v36, %v4893_v7  ;;  %v2393_v35 = vrot.slane %v2365_v13, %v4893_v7 }
 0x163   : > { %v2696_v22 = vrot.slane %v2695_v9, 4  ;;  %v2710_v34 = vrot.slane %v2709_v15, 4  ;;  %v934_v42 = vrot.slane %v933_v4, 2  ;;  %v6596_v14 = vcombine.high %v4860_v51, %v4868_v56 }
 0x164   : > { %v2703_v40 = vrot.slane %v2702_v12, 4  ;;  %v2372_v52 = vrot.slane %v2363_v57, %v4893_v7  ;;  %v2379_v39 = vrot.slane %v2364_v43, %v4893_v7  ;;  %v4350_v55 = vcombine.high %v1543_v37, %v1557_v41 }
 0x165   : > { %v938_v27 = vsel %vm656_vm0, %v6596_v14, 0.0  ;;  %v2716_v61 = vsel %vm2540_vm6, %v2339_v6, 0.0  ;;  %v928_v60 = vadd.f32 %v927_v24, %v926_v50  ;;  %v945_v28 = vsel %vm656_vm0, %v4332_v0, 0.0 }
 0x166   : > { %v939_v36 = vrot.slane %v938_v27, 4  ;;  %v5379_v13 = vadd.f32 %v2689_v18, %v2688_v33  ;;  %v2394_v10 = vcombine.low %v2372_v52, %v2386_v11  ;;  %v2395_v51 = vcombine.low %v2379_v39, %v2393_v35 }
 0x167   : > { %v5382_v14 = vadd.f32 %v2710_v34, %v2709_v15  ;;  %v5384_v57 = vadd.f32 %v934_v42, %v933_v4  ;;  %v946_v43 = vrot.slane %v945_v28, 4  ;;  %v5386_v37 = vadd.f32 %v2696_v22, %v2695_v9 }
 0x168   : > { %6597 = vst [vmem:[#allocation16_spill] sm:$0xff] %v5379_v13  ;;  %v5388_v41 = vadd.f32 %v2703_v40, %v2702_v12  ;;  %v2717_v50 = vrot.slane %v2716_v61, 4  ;;  %v2723_v0 = vsel %vm2540_vm6, %v2394_v10, 0.0  ;;  %v2404_v6 = vrot.slane %v4350_v55, %v4893_v7 }
 0x169   : > { %6598 = vst [vmem:[#allocation17_spill] sm:$0xff] %v5386_v37  ;;  %v5393_v33 = vsel %vm2540_vm6, %v2395_v51, 0.0  ;;  %v929_v18 = vrot.slane %v928_v60, 1  ;;  %v940_v24 = vadd.f32 %v939_v36, %v938_v27  ;;  %v1562_v15 = vcombine.low %v5115_v46, %v5123_v2 }
 0x16a   : > { %6599 = vst [vmem:[#allocation18_spill] sm:$0xff] %v5388_v41  ;;  %v1563_v4 = vcombine.high %v5115_v46, %v5123_v2  ;;  %v810_v9 = vcombine.low %v4883_v5, %v4956_v20  ;;  %v811_v12 = vcombine.high %v4883_v5, %v4956_v20  ;;  %v2724_v11 = vrot.slane %v2723_v0, 4 }
 0x16b   : > { %v947_v22 = vadd.f32 %v946_v43, %v945_v28  ;;  %v5405_v34 = vadd.f32 %v2717_v50, %v2716_v61  ;;  %v1570_v42 = vrot.slane %v1562_v15, %v4893_v7  ;;  %v4333_v46 = vcombine.low %v4956_v20, %v4956_v20 }
 0x16c   : > { %v1577_v27 = vrot.slane %v1563_v4, %v4893_v7  ;;  %v5412_v40 = vadd.f32 %v929_v18, %v928_v60  ;;  %v941_v5 = vrot.slane %v940_v24, 2  ;;  %v952_v52 = vsel %vm656_vm0, %v810_v9, 0.0 }
 0x16d   : > { %6600 = vst [vmem:[#allocation19_spill] sm:$0xff] %v5405_v34  ;;  %v1578_v39 = vcombine.high %v1570_v42, %v1570_v42  ;;  %v1586_v36 = vrot.slane %v1570_v42, %v4893_v7  ;;  %v5417_v28 = vadd.f32 %v2724_v11, %v2723_v0  ;;  %v948_v51 = vrot.slane %v947_v22, 2 }
 0x16e   : > { %v1579_v55 = vcombine.high %v1577_v27, %v1577_v27  ;;  %v1593_v61 = vrot.slane %v1577_v27, %v4893_v7  ;;  %v953_v43 = vrot.slane %v952_v52, 4  ;;  %v959_v50 = vsel %vm656_vm0, %v4333_v46, 0.0 }
 0x16f   : > { %6601 = vst [vmem:[#allocation20_spill] sm:$0xff] %v5417_v28  ;;  %v1600_v15 = vrot.slane %v1578_v39, %v4893_v7  ;;  %v1608_v18 = vcombine.high %v1586_v36, %v1586_v36  ;;  %v942_v56 = vadd.f32 %v941_v5, %v940_v24  ;;  %v960_v58 = vrot.slane %v959_v50, 4 }
 0x170   : > { %v1607_v60 = vrot.slane %v1579_v55, %v4893_v7  ;;  %v1609_v4 = vcombine.high %v1593_v61, %v1593_v61  ;;  %v954_v9 = vadd.f32 %v953_v43, %v952_v52  ;;  %v966_v2 = vsel %vm656_vm0, %v811_v12, 0.0 }
 0x171   : > { %v1610_v42 = vcombine.high %v1600_v15, %v1600_v15  ;;  %v2397_v27 = vcombine.low %v1586_v36, %v1600_v15  ;;  %v2418_v0 = vrot.slane %v1608_v18, %v4893_v7  ;;  %v4334_v46 = vcombine.high %v4956_v20, %v4956_v20 }
 0x172   : > { %v1611_v35 = vcombine.high %v1607_v60, %v1607_v60  ;;  %v2453_v11 = vcombine.low %v1607_v60, %v1609_v4  ;;  %v955_v10 = vrot.slane %v954_v9, 2  ;;  %v961_v39 = vadd.f32 %v960_v58, %v959_v50 }
 0x173   : > { %v949_v41 = vadd.f32 %v948_v51, %v947_v22  ;;  %v2411_v55 = vrot.slane %v2397_v27, %v4893_v7  ;;  %v2421_v37 = vcombine.high %v2418_v0, %v2418_v0  ;;  %v2452_v24 = vcombine.low %v1610_v42, %v1593_v61 }
 0x174   : > { %v2442_v5 = vrot.slane %v2418_v0, %v4893_v7  ;;  %v2467_v12 = vrot.slane %v2453_v11, %v4893_v7  ;;  %v2474_v52 = vrot.slane %v1611_v35, %v4893_v7  ;;  %v967_v36 = vrot.slane %v966_v2, 4 }
 0x175   : > { %v2419_v43 = vcombine.low %v2404_v6, %v2411_v55  ;;  %v2420_v15 = vcombine.high %v2404_v6, %v2411_v55  ;;  %v2449_v60 = vrot.slane %v2421_v37, %v4893_v7  ;;  %v2460_v20 = vrot.slane %v2452_v24, %v4893_v7 }
 0x176   : > { %v2477_v18 = vcombine.high %v2474_v52, %v2474_v52  ;;  %v2498_v58 = vrot.slane %v2474_v52, %v4893_v7  ;;  %v956_v22 = vadd.f32 %v955_v10, %v954_v9  ;;  %v962_v51 = vrot.slane %v961_v39, 2 }
 0x177   : > { %v2428_v61 = vrot.slane %v2419_v43, %v4893_v7  ;;  %v2435_v50 = vrot.slane %v2420_v15, %v4893_v7  ;;  %v2475_v4 = vcombine.low %v2460_v20, %v2467_v12  ;;  %v2476_v42 = vcombine.high %v2460_v20, %v2467_v12 }
 0x178   : > { %v943_v27 = vrot.slane %v942_v56, 1  ;;  %v950_v35 = vrot.slane %v949_v41, 1  ;;  %v2505_v0 = vrot.slane %v2477_v18, %v4893_v7  ;;  %v968_v6 = vadd.f32 %v967_v36, %v966_v2 }
 0x179   : > { %v2450_v11 = vcombine.low %v2428_v61, %v2442_v5  ;;  %v2451_v37 = vcombine.low %v2435_v50, %v2449_v60  ;;  %v2484_v55 = vrot.slane %v2475_v4, %v4893_v7  ;;  %v2491_v24 = vrot.slane %v2476_v42, %v4893_v7 }
 0x17a   : > { %v957_v52 = vrot.slane %v956_v22, 1  ;;  %v963_v10 = vadd.f32 %v962_v51, %v961_v39  ;;  %v973_v9 = vsel %vm656_vm0, %v4334_v46, 0.0  ;;  %v812_v43 = vcombine.low %v4994_v23, %v5001_v29 }
 0x17b   : > { %v6602_v12 = vrot.slane %v5382_v14, 2  ;;  %v6604_v2 = vrot.slane %v5384_v57, 1  ;;  %v2506_v36 = vcombine.low %v2484_v55, %v2498_v58  ;;  %v2507_v60 = vcombine.low %v2491_v24, %v2505_v0 }
 0x17c   : > { %v6605_v46 = vrot.slane %v5393_v33, 4  ;;  %v969_v20 = vrot.slane %v968_v6, 2  ;;  %v974_v18 = vrot.slane %v973_v9, 4  ;;  %v813_v61 = vcombine.high %v4994_v23, %v5001_v29 }
 0x17d   : > { %v5444_v15 = vadd.f32 %v6602_v12, %v5382_v14  ;;  %v5449_v5 = vadd.f32 %v6604_v2, %v5384_v57  ;;  %v2737_v14 = vsel %vm2540_vm6, %v2450_v11, 0.0  ;;  %v4335_v57 = vcombine.low %v5001_v29, %v5001_v29 }
 0x17e   : > { %v5455_v39 = vadd.f32 %v6605_v46, %v5393_v33  ;;  %v5463_v58 = vadd.f32 %v943_v27, %v942_v56  ;;  %v5465_v50 = vadd.f32 %v950_v35, %v949_v41  ;;  %v5467_v4 = vadd.f32 %v957_v52, %v956_v22 }
 0x17f   : > { %6603 = vst [vmem:[#allocation21_spill] sm:$0xff] %v5444_v15  ;;  %v964_v33 = vrot.slane %v963_v10, 1  ;;  %v2744_v42 = vsel %vm2540_vm6, %v2451_v37, 0.0  ;;  %v975_v0 = vadd.f32 %v974_v18, %v973_v9  ;;  %v4336_v55 = vcombine.high %v5001_v29, %v5001_v29 }
 0x180   : > { %6606 = vst [vmem:[#allocation22_spill] sm:$0xff] %v5455_v39  ;;  %v980_v11 = vsel %vm656_vm0, %v812_v43, 0.0  ;;  %v2738_v24 = vrot.slane %v2737_v14, 4  ;;  %v2751_v23 = vsel %vm2540_vm6, %v2506_v36, 0.0  ;;  %v970_v12 = vadd.f32 %v969_v20, %v968_v6 }
 0x181   : > { %v981_v2 = vrot.slane %v980_v11, 4  ;;  %v2758_v56 = vsel %vm2540_vm6, %v2507_v60, 0.0  ;;  %v976_v41 = vrot.slane %v975_v0, 2  ;;  %v987_v22 = vsel %vm656_vm0, %v4335_v57, 0.0 }
 0x182   : > { %v994_v27 = vsel %vm656_vm0, %v813_v61, 0.0  ;;  %v988_v37 = vrot.slane %v987_v22, 4  ;;  %v1001_v9 = vsel %vm656_vm0, %v4336_v55, 0.0  ;;  %v814_v43 = vcombine.low %v5039_v63, %v5057_v45 }
 0x183   : > { %v982_v35 = vadd.f32 %v981_v2, %v980_v11  ;;  %v995_v52 = vrot.slane %v994_v27, 4  ;;  %v977_v29 = vadd.f32 %v976_v41, %v975_v0  ;;  %v1002_v46 = vrot.slane %v1001_v9, 4 }
 0x184   : > { %v815_v6 = vcombine.high %v5039_v63, %v5057_v45  ;;  %v989_v60 = vadd.f32 %v988_v37, %v987_v22  ;;  %v4337_v18 = vcombine.low %v5057_v45, %v5057_v45  ;;  %v5484_v61 = vadd.f32 %v964_v33, %v963_v10 }
 0x185   : > { %v983_v36 = vrot.slane %v982_v35, 2  ;;  %v996_v20 = vadd.f32 %v995_v52, %v994_v27  ;;  %v1003_v57 = vadd.f32 %v1002_v46, %v1001_v9  ;;  %v4338_v55 = vcombine.high %v5057_v45, %v5057_v45 }
 0x186   : > { %v1008_v0 = vsel %vm656_vm0, %v814_v43, 0.0  ;;  %v5489_v11 = vadd.f32 %v2738_v24, %v2737_v14  ;;  %v2745_v2 = vrot.slane %v2744_v42, 4  ;;  %v2752_v41 = vrot.slane %v2751_v23, 4 }
 0x187   : > { %v984_v51 = vadd.f32 %v983_v36, %v982_v35  ;;  %v2759_v63 = vrot.slane %v2758_v56, 4  ;;  %v1009_v7 = vrot.slane %v1008_v0, 4  ;;  %v1015_v22 = vsel %vm656_vm0, %v4337_v18, 0.0 }
 0x188   : > { %6607 = vst [vmem:[#allocation23_spill] sm:$0xff] %v5489_v11  ;;  %v1022_v27 = vsel %vm656_vm0, %v815_v6, 0.0  ;;  %v971_v37 = vrot.slane %v970_v12, 1  ;;  %v978_v10 = vrot.slane %v977_v29, 1  ;;  %v990_v33 = vrot.slane %v989_v60, 2 }
 0x189   : > { %v997_v52 = vrot.slane %v996_v20, 2  ;;  %v1004_v9 = vrot.slane %v1003_v57, 2  ;;  %v1016_v46 = vrot.slane %v1015_v22, 4  ;;  %v1023_v45 = vrot.slane %v1022_v27, 4 }
 0x18a   : > { %v1029_v43 = vsel %vm656_vm0, %v4338_v55, 0.0  ;;  %v5495_v24 = vadd.f32 %v2745_v2, %v2744_v42  ;;  %v5497_v35 = vadd.f32 %v2752_v41, %v2751_v23  ;;  %v985_v36 = vrot.slane %v984_v51, 1 }
 0x18b   : > { %v1010_v39 = vadd.f32 %v1009_v7, %v1008_v0  ;;  %v1017_v18 = vadd.f32 %v1016_v46, %v1015_v22  ;;  %v1024_v28 = vadd.f32 %v1023_v45, %v1022_v27  ;;  %v1030_v6 = vrot.slane %v1029_v43, 4 }
 0x18c   : > { %6608 = vst [vmem:[#allocation24_spill] sm:$0xff] %v5495_v24  ;;  %6609 = vst [vmem:[#allocation25_spill] sm:$0xff] %v5497_v35  ;;  %v5499_v34 = vadd.f32 %v2759_v63, %v2758_v56  ;;  %v5501_v15 = vadd.f32 %v971_v37, %v970_v12  ;;  %v991_v13 = vadd.f32 %v990_v33, %v989_v60 }
 0x18d   : > { %v816_v32 = vcombine.low %v5098_v21, %v5107_v3  ;;  %v5505_v55 = vadd.f32 %v978_v10, %v977_v29  ;;  %v998_v14 = vadd.f32 %v997_v52, %v996_v20  ;;  %v1005_v42 = vadd.f32 %v1004_v9, %v1003_v57 }
 0x18e   : > { %6610 = vst [vmem:[#allocation26_spill] sm:$0xff] %v5499_v34  ;;  %v1031_v2 = vadd.f32 %v1030_v6, %v1029_v43  ;;  %v5507_v23 = vadd.f32 %v985_v36, %v984_v51  ;;  %v817_v7 = vcombine.high %v5098_v21, %v5107_v3  ;;  %v4339_v56 = vcombine.low %v5107_v3, %v5107_v3 }
 0x18f   : > { %v4340_v12 = vcombine.high %v5107_v3, %v5107_v3  ;;  %v1011_v60 = vrot.slane %v1010_v39, 2  ;;  %v1018_v0 = vrot.slane %v1017_v18, 2  ;;  %v1025_v41 = vrot.slane %v1024_v28, 2 }
 0x190   : > { %v1036_v29 = vsel %vm656_vm0, %v816_v32, 0.0  ;;  %v992_v63 = vrot.slane %v991_v13, 1  ;;  %v1043_v57 = vsel %vm656_vm0, %v4339_v56, 0.0  ;;  %v1050_v51 = vsel %vm656_vm0, %v817_v7, 0.0 }
 0x191   : > { %v1037_v20 = vrot.slane %v1036_v29, 4  ;;  %v999_v22 = vrot.slane %v998_v14, 1  ;;  %v1006_v27 = vrot.slane %v1005_v42, 1  ;;  %v1032_v21 = vrot.slane %v1031_v2, 2 }
 0x192   : > { %v1044_v37 = vrot.slane %v1043_v57, 4  ;;  %v1051_v33 = vrot.slane %v1050_v51, 4  ;;  %v1057_v52 = vsel %vm656_vm0, %v4340_v12, 0.0  ;;  %v818_v3 = vcombine.low %v5135_v62, %v5146_v8 }
 0x193   : > { %v1038_v10 = vadd.f32 %v1037_v20, %v1036_v29  ;;  %v1012_v9 = vadd.f32 %v1011_v60, %v1010_v39  ;;  %v1019_v46 = vadd.f32 %v1018_v0, %v1017_v18  ;;  %v1026_v32 = vadd.f32 %v1025_v41, %v1024_v28 }
 0x194   : > { %v1045_v45 = vadd.f32 %v1044_v37, %v1043_v57  ;;  %v1052_v36 = vadd.f32 %v1051_v33, %v1050_v51  ;;  %v1058_v6 = vrot.slane %v1057_v52, 4  ;;  %v819_v7 = vcombine.high %v5135_v62, %v5146_v8 }
 0x195   : > { %v1039_v43 = vrot.slane %v1038_v10, 2  ;;  %v5523_v56 = vadd.f32 %v992_v63, %v991_v13  ;;  %v1033_v34 = vadd.f32 %v1032_v21, %v1031_v2  ;;  %v4341_v12 = vcombine.low %v5146_v8, %v5146_v8 }
 0x196   : > { %v1046_v29 = vrot.slane %v1045_v45, 2  ;;  %v1059_v35 = vadd.f32 %v1058_v6, %v1057_v52  ;;  %v4342_v39 = vcombine.high %v5146_v8, %v5146_v8  ;;  %v1064_v28 = vsel %vm656_vm0, %v818_v3, 0.0 }
 0x197   : > { %v1040_v20 = vadd.f32 %v1039_v43, %v1038_v10  ;;  %v1013_v18 = vrot.slane %v1012_v9, 1  ;;  %v1065_v60 = vrot.slane %v1064_v28, 4  ;;  %v1071_v0 = vsel %vm656_vm0, %v4341_v12, 0.0 }
 0x198   : > { %v1078_v62 = vsel %vm656_vm0, %v819_v7, 0.0  ;;  %v1020_v13 = vrot.slane %v1019_v46, 1  ;;  %v1027_v41 = vrot.slane %v1026_v32, 1  ;;  %v1053_v2 = vrot.slane %v1052_v36, 2 }
 0x199   : > { %v1072_v63 = vrot.slane %v1071_v0, 4  ;;  %v1047_v57 = vadd.f32 %v1046_v29, %v1045_v45  ;;  %v1060_v51 = vrot.slane %v1059_v35, 2  ;;  %v1066_v21 = vadd.f32 %v1065_v60, %v1064_v28 }
 0x19a   : > { %v1079_v37 = vrot.slane %v1078_v62, 4  ;;  %v1034_v10 = vrot.slane %v1033_v34, 1  ;;  %v1041_v33 = vrot.slane %v1040_v20, 1  ;;  %v1085_v8 = vsel %vm656_vm0, %v4342_v39, 0.0 }
 0x19b   : > { %v1073_v52 = vadd.f32 %v1072_v63, %v1071_v0  ;;  %v5533_v3 = vadd.f32 %v999_v22, %v998_v14  ;;  %v5535_v43 = vadd.f32 %v1006_v27, %v1005_v42  ;;  %v1067_v6 = vrot.slane %v1066_v21, 2 }
 0x19c   : > { %v1080_v12 = vadd.f32 %v1079_v37, %v1078_v62  ;;  %v5537_v7 = vadd.f32 %v1013_v18, %v1012_v9  ;;  %v5539_v24 = vadd.f32 %v1020_v13, %v1019_v46  ;;  %v5541_v11 = vadd.f32 %v1027_v41, %v1026_v32  ;;  %v2797_v62 = vld [vmem:[%s6545_s4] sm:$0x3] }
 0x19d   : > { %v1054_v45 = vadd.f32 %v1053_v2, %v1052_v36  ;;  %v1048_v29 = vrot.slane %v1047_v57, 1  ;;  %v1061_v28 = vadd.f32 %v1060_v51, %v1059_v35  ;;  %v1086_v60 = vrot.slane %v1085_v8, 4  ;;  %v6614_v2 = vld [vmem:[#allocation2_spill] sm:$0xff] }
 0x19e   : > { %v2546_v0 = vrot.slane %v5138_v16, 1  ;;  %v5544_v63 = vadd.f32 %v1034_v10, %v1033_v34  ;;  %v5546_v14 = vadd.f32 %v1041_v33, %v1040_v20  ;;  %v1074_v42 = vrot.slane %v1073_v52, 2 }
 0x19f   : > { %v6611_v22 = vrot.slane %v5072_v19, 2  ;;  %v1068_v9 = vadd.f32 %v1067_v6, %v1066_v21  ;;  %v1081_v46 = vrot.slane %v1080_v12, 2  ;;  %v5552_v32 = vsub.s32 0, %v4856_v48 }
 0x1a0   : > { %v2547_v36 = vadd.f32 %v2546_v0, %v5138_v16  ;;  %v1055_v35 = vrot.slane %v1054_v45, 1  ;;  %v6612_v34 = vrot.slane %v5089_v30, 2  ;;  %v2565_v20 = vrot.slane %v5151_v47, 2  ;;  %v5570_v16 = vld [vmem:[%s6548_s7] sm:$0x7]  ;;  %v6616_v0 = vld [vmem:[#allocation3_spill] sm:$0xff] }
 0x1a1   : > { %v2552_v27 = vadd.f32 %v6611_v22, %v5072_v19  ;;  %v5562_v19 = vadd.f32 %v1048_v29, %v1047_v57  ;;  %v1062_v13 = vrot.slane %v1061_v28, 1  ;;  %v1087_v41 = vadd.f32 %v1086_v60, %v1085_v8 }
 0x1a2   : > { %v2559_v18 = vadd.f32 %v6612_v34, %v5089_v30  ;;  %v2765_v51 = vadd.f32 %v2547_v36, %v6614_v2  ;;  %v5565_v21 = vadd.f32 %v1074_v42, %v1073_v52  ;;  %v2566_v10 = vadd.f32 %v2565_v20, %v5151_v47 }
 0x1a3   : > { %v2553_v39 = vrot.slane %v2552_v27, 1  ;;  %6613 = vst [vmem:[#allocation27_spill] sm:$0xff] %v5562_v19  ;;  %v1069_v33 = vrot.slane %v1068_v9, 1  ;;  %v5573_v6 = vadd.f32 %v1081_v46, %v1080_v12  ;;  %v5576_v57 = vrot.slane %v2797_v62, %v5552_v32 }
 0x1a4   : > { %v2560_v37 = vrot.slane %v2559_v18, 1  ;;  %v2805_v8 = vsub.s32 1, %v4856_v48  ;;  %v5579_v29 = vadd.f32 %v1055_v35, %v1054_v45  ;;  %v2567_v60 = vrot.slane %v2566_v10, 1  ;;  %v6618_v45 = vld [vmem:[#allocation4_spill] sm:$0xff] }
 0x1a5   : > { %v2554_v30 = vadd.f32 %v2553_v39, %v2552_v27  ;;  %v5582_v22 = vadd.f32 %v1062_v13, %v1061_v28  ;;  %v5586_v27 = vrot.slane %v5570_v16, %v5552_v32  ;;  %v2809_v12 = vadd.f32 %v5576_v57, %v2765_v51  ;;  %v6620_v13 = vld [vmem:[#allocation5_spill] sm:$0xff] }
 0x1a6   : > { %6615 = vst [vmem:[#allocation2_spill] sm:$0xff] %v5579_v29  ;;  %v2561_v52 = vadd.f32 %v2560_v37, %v2559_v18  ;;  %v5588_v47 = vrot.slane %v2797_v62, %v2805_v8  ;;  %v1088_v36 = vrot.slane %v1087_v41, 2  ;;  %v2568_v39 = vadd.f32 %v2567_v60, %v2566_v10  ;;  %v6622_v37 = vld [vmem:[#allocation8_spill] sm:$0xff] }
 0x1a7   : > { %v2766_v42 = vadd.f32 %v2554_v30, %v6616_v0  ;;  %6617 = vst [vmem:[#allocation3_spill] sm:$0xff] %v5582_v22  ;;  %v5593_v34 = vadd.f32 %v1069_v33, %v1068_v9  ;;  %v2841_v20 = vmax.f32 %v2809_v12, 0.0  ;;  %v6621_v51 = vrot.slane %v5182_v44, 2  ;;  %v6623_v9 = vld [vmem:[#allocation11_spill] sm:$0xff]  ;;  %v6624_v60 = vld [vmem:[#allocation12_spill] sm:$0xff] }
 0x1a8   : > { %v2767_v35 = vadd.f32 %v2561_v52, %v6618_v45  ;;  %v2768_v2 = vadd.f32 %v2568_v39, %v6620_v13  ;;  %v2579_v0 = vrot.slane %v6622_v37, 2  ;;  %v2586_v33 = vrot.slane %v6623_v9, 2 }
 0x1a9   : > { %6619 = vst [vmem:[#allocation4_spill] sm:$0xff] %v5593_v34  ;;  %v2810_v28 = vadd.f32 %v5588_v47, %v2766_v42  ;;  %v2573_v30 = vadd.f32 %v6621_v51, %v5182_v44  ;;  %v5604_v52 = vrot.slane %v2841_v20, %v5552_v32  ;;  %v2593_v45 = vrot.slane %v6624_v60, 2 }
 0x1aa   : > { %v2811_v62 = vadd.f32 %v5576_v57, %v2767_v35  ;;  %v2812_v42 = vadd.f32 %v5588_v47, %v2768_v2  ;;  %v2580_v35 = vadd.f32 %v2579_v0, %v6622_v37  ;;  %v5610_v13 = vadd.f32 %v1088_v36, %v1087_v41  ;;  %v6629_v2 = vld [vmem:[#allocation10_spill] sm:$0xff] }
 0x1ab   : > { %v2842_v10 = vmax.f32 %v2810_v28, 0.0  ;;  %v2574_v39 = vrot.slane %v2573_v30, 1  ;;  %v2587_v28 = vadd.f32 %v2586_v33, %v6623_v9  ;;  %v2594_v20 = vadd.f32 %v2593_v45, %v6624_v60  ;;  %v6626_v33 = vld [vmem:[#allocation13_spill] sm:$0xff] }
 0x1ac   : > { %v2843_v12 = vmax.f32 %v2811_v62, 0.0  ;;  %v2844_v51 = vmax.f32 %v2812_v42, 0.0  ;;  %v2581_v34 = vrot.slane %v2580_v35, 1  ;;  %v5623_v62 = vrot.slane %v5570_v16, %v2805_v8 }
 0x1ad   : > { %v5613_v44 = vrot.slane %v2842_v10, %v5552_v32  ;;  %v2575_v46 = vadd.f32 %v2574_v39, %v2573_v30  ;;  %v2588_v41 = vrot.slane %v2587_v28, 1  ;;  %v2595_v36 = vrot.slane %v2594_v20, 1  ;;  %v6625_v10 = vld [vmem:[#allocation6_spill] sm:$0xff]  ;;  %v6627_v30 = vld [vmem:[#allocation9_spill] sm:$0xff] }
 0x1ae   : > { %v5618_v18 = vrot.slane %v2843_v12, %v5552_v32  ;;  %v5626_v37 = vrot.slane %v2844_v51, %v5552_v32  ;;  %v2582_v0 = vadd.f32 %v2581_v34, %v2580_v35  ;;  %v2602_v60 = vrot.slane %v6626_v33, 1  ;;  %v6631_v51 = vld [vmem:[#allocation7_spill] sm:$0xff] }
 0x1af   : > { %v2769_v9 = vadd.f32 %v2575_v46, %v6625_v10  ;;  %v2589_v45 = vadd.f32 %v2588_v41, %v2587_v28  ;;  %v2596_v42 = vadd.f32 %v2595_v36, %v2594_v20  ;;  %v6628_v12 = vrot.slane %v6627_v30, 2 }
 0x1b0   : > { %v6630_v8 = vrot.slane %v6629_v2, 2  ;;  %v3034_v29 = vcombine.low %v5618_v18, %v5626_v37  ;;  %v2770_v19 = vadd.f32 %v2582_v0, %v6631_v51  ;;  %v2603_v46 = vadd.f32 %v2602_v60, %v6626_v33 }
 0x1b1   : > { %v2608_v39 = vadd.f32 %v6628_v12, %v6627_v30  ;;  %v2813_v34 = vadd.f32 %v5576_v57, %v2769_v9  ;;  %v2771_v35 = vadd.f32 %v2589_v45, %v5314_v31  ;;  %v2772_v28 = vadd.f32 %v2596_v42, %v5317_v53  ;;  %v6632_v30 = vld [vmem:[#allocation14_spill] sm:$0xff] }
 0x1b2   : > { %v2615_v22 = vadd.f32 %v6630_v8, %v6629_v2  ;;  %v2814_v36 = vadd.f32 %v5588_v47, %v2770_v19  ;;  %v2621_v2 = vrot.slane %v6632_v30, 2  ;;  %v2773_v12 = vadd.f32 %v2603_v46, %v5412_v40 }
 0x1b3   : > { %v2609_v20 = vrot.slane %v2608_v39, 1  ;;  %v2845_v10 = vmax.f32 %v2813_v34, 0.0  ;;  %v2815_v8 = vadd.f32 %v5576_v57, %v2771_v35  ;;  %v2816_v0 = vadd.f32 %v5588_v47, %v2772_v28 }
 0x1b4   : > { %v2616_v41 = vrot.slane %v2615_v22, 1  ;;  %v2846_v33 = vmax.f32 %v2814_v36, 0.0  ;;  %v2622_v53 = vadd.f32 %v2621_v2, %v6632_v30  ;;  %v2817_v60 = vadd.f32 %v5576_v57, %v2773_v12 }
 0x1b5   : > { %v2610_v9 = vadd.f32 %v2609_v20, %v2608_v39  ;;  %v5649_v31 = vrot.slane %v2845_v10, %v5552_v32  ;;  %v2847_v19 = vmax.f32 %v2815_v8, 0.0  ;;  %v2848_v45 = vmax.f32 %v2816_v0, 0.0 }
 0x1b6   : > { %v2617_v51 = vadd.f32 %v2616_v41, %v2615_v22  ;;  %v5656_v34 = vrot.slane %v2846_v33, %v5552_v32  ;;  %v2623_v46 = vrot.slane %v2622_v53, 1  ;;  %v2849_v39 = vmax.f32 %v2817_v60, 0.0 }
 0x1b7   : > { %v2774_v42 = vadd.f32 %v2610_v9, %v5449_v5  ;;  %v6633_v22 = vrot.slane %v5268_v17, 2  ;;  %v5662_v28 = vrot.slane %v2847_v19, %v5552_v32  ;;  %v5665_v20 = vrot.slane %v2848_v45, %v5552_v32 }
 0x1b8   : > { %v2775_v40 = vadd.f32 %v2617_v51, %v5463_v58  ;;  %v3035_v58 = vcombine.low %v5649_v31, %v5656_v34  ;;  %v2624_v36 = vadd.f32 %v2623_v46, %v2622_v53  ;;  %v5672_v10 = vrot.slane %v2849_v39, %v5552_v32 }
 0x1b9   : > { %v2629_v35 = vadd.f32 %v6633_v22, %v5268_v17  ;;  %v2818_v41 = vadd.f32 %v5588_v47, %v2774_v42  ;;  %v3036_v17 = vcombine.low %v5662_v28, %v5665_v20  ;;  %v2635_v8 = vrot.slane %v5299_v38, 2 }
 0x1ba   : > { %v2819_v5 = vadd.f32 %v5576_v57, %v2775_v40  ;;  %v2776_v0 = vadd.f32 %v2624_v36, %v5465_v50  ;;  %v2642_v51 = vrot.slane %v5304_v26, 2  ;;  %v2649_v33 = vrot.slane %v5307_v59, 2 }
 0x1bb   : > { %v2630_v30 = vrot.slane %v2629_v35, 1  ;;  %v2850_v2 = vmax.f32 %v2818_v41, 0.0  ;;  %v3101_v53 = vsub.s32 2, %v4856_v48  ;;  %v2636_v45 = vadd.f32 %v2635_v8, %v5299_v38 }
 0x1bc   : > { %v2851_v12 = vmax.f32 %v2819_v5, 0.0  ;;  %v2820_v42 = vadd.f32 %v5588_v47, %v2776_v0  ;;  %v2643_v40 = vadd.f32 %v2642_v51, %v5304_v26  ;;  %v2650_v50 = vadd.f32 %v2649_v33, %v5307_v59 }
 0x1bd   : > { %v2631_v9 = vadd.f32 %v2630_v30, %v2629_v35  ;;  %v5682_v60 = vrot.slane %v2850_v2, %v5552_v32  ;;  %v2637_v48 = vrot.slane %v2636_v45, 1  ;;  %v2658_v22 = vrot.slane %v5328_v1, 1 }
 0x1be   : > { %v5685_v19 = vrot.slane %v2851_v12, %v5552_v32  ;;  %v6634_v35 = vrot.slane %v5301_v54, 2  ;;  %v2852_v38 = vmax.f32 %v2820_v42, 0.0  ;;  %v2644_v36 = vrot.slane %v2643_v40, 1 }
 0x1bf   : > { %v2777_v46 = vadd.f32 %v2631_v9, %v5467_v4  ;;  %v2651_v30 = vrot.slane %v2650_v50, 1  ;;  %v5701_v4 = vrot.slane %v5570_v16, %v3101_v53  ;;  %v2638_v12 = vadd.f32 %v2637_v48, %v2636_v45 }
 0x1c0   : > { %v2664_v41 = vadd.f32 %v6634_v35, %v5301_v54  ;;  %v2920_v9 = vrot.slane %v2852_v38, %v5552_v32  ;;  %v2645_v51 = vadd.f32 %v2644_v36, %v2643_v40  ;;  %v2659_v35 = vadd.f32 %v2658_v22, %v5328_v1 }
 0x1c1   : > { %v3197_v5 = vpop.f32.mrb[16].mxu0  ;;  %v2821_v26 = vadd.f32 %v5576_v57, %v2777_v46  ;;  %v2652_v54 = vadd.f32 %v2651_v30, %v2650_v50  ;;  %v2778_v33 = vadd.f32 %v2638_v12, %v5484_v61  ;;  %v6635_v46 = vrot.slane %v5338_v49, 2 }
 0x1c2   : > { %v3198_v59 = vadd.f32 %v3197_v5, %v5586_v27  ;;  %v3199_v2 = vpop.f32.mrb[17].mxu0  ;;  %v2665_v8 = vrot.slane %v2664_v41, 1  ;;  %v3038_v45 = vcombine.low %v5685_v19, %v2920_v9  ;;  %v2779_v48 = vadd.f32 %v2645_v51, %v5501_v15 }
 0x1c3   : > { %v3200_v0 = vadd.f32 %v3199_v2, %v5623_v62  ;;  %v2853_v42 = vmax.f32 %v2821_v26, 0.0  ;;  %v2671_v5 = vadd.f32 %v6635_v46, %v5338_v49  ;;  %v2780_v61 = vadd.f32 %v2652_v54, %v5505_v55 }
 0x1c4   : > { %v2822_v36 = vadd.f32 %v5588_v47, %v2778_v33  ;;  %v2666_v1 = vadd.f32 %v2665_v8, %v2664_v41  ;;  %v6636_v22 = vcombine.low %v5604_v52, %v5613_v44  ;;  %v2823_v55 = vadd.f32 %v5576_v57, %v2779_v48 }
 0x1c5   : > { %v3365_v39 = vcombine.low %v3198_v59, %v3200_v0  ;;  %v3366_v16 = vcombine.high %v3198_v59, %v3200_v0  ;;  %v3203_v53 = vpop.f32.mrb[18].mxu0  ;;  %v2824_v41 = vadd.f32 %v5588_v47, %v2780_v61  ;;  %v2924_v18 = vrot.slane %v2853_v42, %v5552_v32 }
 0x1c6   : > { %v3204_v38 = vadd.f32 %v3203_v53, %v5586_v27  ;;  %v3205_v40 = vpop.f32.mrb[19].mxu0  ;;  %v4448_v50 = vpop.f32.mrb[28].mxu1  ;;  %v2854_v2 = vmax.f32 %v2822_v36, 0.0  ;;  %v2855_v8 = vmax.f32 %v2823_v55, 0.0  ;;  %v2672_v51 = vrot.slane %v2671_v5, 1 }
 0x1c7   : > { %v3397_v49 = vmul.f32 %v3365_v39, %v6636_v22  ;;  %v3398_v30 = vmul.f32 %v3366_v16, %v3034_v29  ;;  %v3206_v19 = vadd.f32 %v3205_v40, %v5623_v62  ;;  %v5723_v15 = vadd.f32 %v4448_v50, %v5701_v4  ;;  %v3320_v26 = vpop.f32.mrb[29].mxu1 }
 0x1c8   : > { %v5726_v59 = vadd.f32 %v3320_v26, %v5701_v4  ;;  %v2856_v0 = vmax.f32 %v2824_v41, 0.0  ;;  %v2928_v46 = vrot.slane %v2854_v2, %v5552_v32  ;;  %v2932_v53 = vrot.slane %v2855_v8, %v5552_v32 }
 0x1c9   : > { %v3367_v52 = vcombine.low %v3204_v38, %v3206_v19  ;;  %v3368_v44 = vcombine.high %v3204_v38, %v3206_v19  ;;  %v3209_v39 = vpop.f32.mrb[20].mxu0  ;;  %v3429_v29 = vcombine.low %v3397_v49, %v3398_v30  ;;  %v6637_v40 = vrot.slane %v5565_v21, 1 }
 0x1ca   : > { %v3210_v37 = vadd.f32 %v3209_v39, %v5586_v27  ;;  %v3211_v12 = vpop.f32.mrb[21].mxu0  ;;  %v4451_v9 = vpop.f32.mrb[30].mxu1  ;;  %v2936_v48 = vrot.slane %v2856_v0, %v5552_v32  ;;  %v3039_v20 = vcombine.low %v2924_v18, %v2928_v46  ;;  %v1090_v61 = vrot.slane %v5610_v13, 1 }
 0x1cb   : > { %v5735_v54 = vmul.f32 %v3367_v52, %v3035_v58  ;;  %v5740_v33 = vmul.f32 %v3368_v44, %v3036_v17  ;;  %v3212_v42 = vadd.f32 %v3211_v12, %v5623_v62  ;;  %v3330_v16 = vpop.f32.mrb[31].mxu1  ;;  %v5747_v38 = vadd.f32 %v4451_v9, %v5701_v4 }
 0x1cc   : > { %v5750_v31 = vadd.f32 %v3330_v16, %v5701_v4  ;;  %v3430_v17 = vcombine.high %v3397_v49, %v3398_v30  ;;  %v5755_v50 = vadd.f32 %v6637_v40, %v5565_v21  ;;  %v3040_v22 = vcombine.low %v2932_v53, %v2936_v48 }
 0x1cd   : > { %v3369_v34 = vcombine.low %v3210_v37, %v3212_v42  ;;  %v3370_v58 = vcombine.high %v3210_v37, %v3212_v42  ;;  %v3215_v28 = vpop.f32.mrb[22].mxu0  ;;  %v6638_v55 = vcombine.low %v5672_v10, %v5682_v60  ;;  %v4368_v39 = vcombine.high %v3398_v30, %v3429_v29 }
 0x1ce   : > { %v3216_v36 = vadd.f32 %v3215_v28, %v5586_v27  ;;  %v3217_v19 = vpop.f32.mrb[23].mxu0  ;;  %v5759_v26 = vpop.f32.mrb[32].mxu1  ;;  %v4367_v44 = vcombine.low %v3430_v17, %v3397_v49  ;;  %v2673_v18 = vadd.f32 %v2672_v51, %v2671_v5  ;;  %v2677_v37 = vrot.slane %v5350_v25, 2 }
 0x1cf   : > { %v5764_v41 = vmul.f32 %v3369_v34, %v6638_v55  ;;  %v5766_v2 = vmul.f32 %v3370_v58, %v3038_v45  ;;  %v3218_v52 = vadd.f32 %v3217_v19, %v5623_v62  ;;  %v5769_v21 = vpop.f32.mrb[33].mxu1  ;;  %v2781_v12 = vadd.f32 %v2659_v35, %v5507_v23 }
 0x1d0   : > { %v5773_v42 = vadd.f32 %v4367_v44, %v3397_v49  ;;  %v2782_v10 = vadd.f32 %v2666_v1, %v5523_v56  ;;  %v5779_v45 = vadd.f32 %v4368_v39, %v3398_v30  ;;  %v2678_v46 = vadd.f32 %v2677_v37, %v5350_v25 }
 0x1d1   : > { %v3371_v8 = vcombine.low %v3216_v36, %v3218_v52  ;;  %v3372_v0 = vcombine.high %v3216_v36, %v3218_v52  ;;  %v3221_v9 = vpop.f32.mrb[24].mxu0  ;;  %v2783_v5 = vadd.f32 %v2673_v18, %v5533_v3  ;;  %v2825_v35 = vadd.f32 %v5576_v57, %v2781_v12 }
 0x1d2   : > { %v5777_v60 = vadd.f32 %v3221_v9, %v5586_v27  ;;  %v3223_v29 = vpop.f32.mrb[25].mxu0  ;;  %v2826_v49 = vadd.f32 %v5588_v47, %v2782_v10  ;;  %v3509_v56 = vcombine.low %v5773_v42, %v5779_v45  ;;  %v2679_v1 = vrot.slane %v2678_v46, 1  ;;  %v6641_v10 = vld [vmem:[#allocation16_spill] sm:$0xff] }
 0x1d3   : > { %v5783_v51 = vmul.f32 %v3371_v8, %v3039_v20  ;;  %v5785_v23 = vmul.f32 %v3372_v0, %v3040_v22  ;;  %v2827_v30 = vadd.f32 %v5576_v57, %v2783_v5  ;;  %v5793_v16 = vadd.f32 %v3223_v29, %v5623_v62  ;;  %v6639_v8 = vld [vmem:[#allocation15_spill] sm:$0xff]  ;;  %v6642_v29 = vld [vmem:[#allocation17_spill] sm:$0xff] }
 0x1d4   : > { %v2857_v25 = vmax.f32 %v2825_v35, 0.0  ;;  %v2858_v3 = vmax.f32 %v2826_v49, 0.0  ;;  %v3431_v48 = vcombine.low %v5735_v54, %v5740_v33  ;;  %v3432_v34 = vcombine.high %v5735_v54, %v5740_v33  ;;  %3541 = vrot.lane.b32.xlu0 %v3509_v56, %s4535_s16  ;;  %v6643_v49 = vld [vmem:[#allocation18_spill] sm:$0xff] }
 0x1d5   : > { %v3227_v53 = vpop.f32.mrb[26].mxu0  ;;  %v2680_v58 = vadd.f32 %v2679_v1, %v2678_v46  ;;  %v2859_v28 = vmax.f32 %v2827_v30, 0.0  ;;  %v3373_v20 = vcombine.low %v5777_v60, %v5793_v16  ;;  %v3374_v17 = vcombine.high %v5777_v60, %v5793_v16 }
 0x1d6   : > { %v3229_v40 = vpop.f32.mrb[27].mxu0  ;;  %v2940_v36 = vrot.slane %v2857_v25, %v5552_v32  ;;  %v2944_v22 = vrot.slane %v2858_v3, %v5552_v32  ;;  %v5807_v19 = vadd.f32 %v3227_v53, %v5586_v27  ;;  %v4369_v55 = vcombine.low %v3432_v34, %v5735_v54 }
 0x1d7   : > { %v2784_v52 = vadd.f32 %v2680_v58, %v5535_v43  ;;  %v2948_v44 = vrot.slane %v2859_v28, %v5552_v32  ;;  %v4370_v39 = vcombine.high %v5740_v33, %v3431_v48  ;;  %v3510_v18 = vcombine.high %v5773_v42, %v5779_v45 }
 0x1d8   : > { %v3041_v37 = vcombine.low %v2940_v36, %v2944_v22  ;;  %v5816_v12 = vadd.f32 %v4369_v55, %v5735_v54  ;;  %v6640_v0 = vrot.slane %v6639_v8, 2  ;;  %v2691_v60 = vrot.slane %v6641_v10, 2 }
 0x1d9   : > { %v3233_v46 = vpop.f32.mrb[28].mxu0  ;;  %v2828_v43 = vadd.f32 %v5588_v47, %v2784_v52  ;;  %v5824_v5 = vadd.f32 %v4370_v39, %v5740_v33  ;;  %3557 = vrot.lane.b32.xlu0 %v3510_v18, %s4535_s16  ;;  %v2698_v35 = vrot.slane %v6642_v29, 2  ;;  %v2705_v56 = vrot.slane %v6643_v49, 2 }
 0x1da   : > { %v2685_v9 = vadd.f32 %v6640_v0, %v6639_v8  ;;  %v5829_v54 = vpop.f32.mrb[29].mxu0  ;;  %v5831_v1 = vmul.f32 %v3373_v20, %v3041_v37  ;;  %v2692_v16 = vadd.f32 %v2691_v60, %v6641_v10  ;;  %v5835_v25 = vadd.f32 %v3229_v40, %v5623_v62 }
 0x1db   : > { %v2860_v3 = vmax.f32 %v2828_v43, 0.0  ;;  %v3512_v33 = vcombine.high %v5816_v12, %v5824_v5  ;;  %v2699_v53 = vadd.f32 %v2698_v35, %v6642_v29  ;;  %v2706_v48 = vadd.f32 %v2705_v56, %v6643_v49 }
 0x1dc   : > { %v2686_v30 = vrot.slane %v2685_v9, 1  ;;  %v2693_v58 = vrot.slane %v2692_v16, 1  ;;  %v3375_v28 = vcombine.low %v5807_v19, %v5835_v25  ;;  %v3376_v20 = vcombine.high %v5807_v19, %v5835_v25 }
 0x1dd   : > { %v3239_v36 = vpop.f32.mrb[30].mxu0  ;;  %v2952_v40 = vrot.slane %v2860_v3, %v5552_v32  ;;  %3559 = vrot.lane.b32.xlu1 %v3512_v33, %s4535_s16  ;;  %v2700_v22 = vrot.slane %v2699_v53, 1  ;;  %v2707_v55 = vrot.slane %v2706_v48, 1  ;;  %v5849_v52 = vadd.f32 %v5759_v26, %v5701_v4 }
 0x1de   : > { %v2687_v34 = vadd.f32 %v2686_v30, %v2685_v9  ;;  %v5851_v39 = vpop.f32.mrb[31].mxu0  ;;  %v6644_v18 = vrot.slane %v5573_v6, 1  ;;  %v2694_v8 = vadd.f32 %v2693_v58, %v2692_v16  ;;  %v5861_v9 = vadd.f32 %v5769_v21, %v5701_v4  ;;  %v6646_v58 = vld [vmem:[#allocation19_spill] sm:$0xff] }
 0x1df   : > { %v5866_v10 = vadd.f32 %v1090_v61, %v5610_v13  ;;  %v3042_v26 = vcombine.low %v2948_v44, %v2952_v40  ;;  %v2701_v60 = vadd.f32 %v2700_v22, %v2699_v53  ;;  %v2708_v43 = vadd.f32 %v2707_v55, %v2706_v48 }
 0x1e0   : > { %v5856_v37 = vadd.f32 %v6644_v18, %v5573_v6  ;;  %v2785_v0 = vadd.f32 %v2687_v34, %v5537_v7  ;;  %v2786_v29 = vadd.f32 %v2694_v8, %v5539_v24  ;;  %v5871_v35 = vadd.f32 %v3233_v46, %v5586_v27 }
 0x1e1   : > { %v3433_v7 = vcombine.low %v5764_v41, %v5766_v2  ;;  %v5875_v21 = vpop.f32.mrb[32].mxu0  ;;  %v5877_v49 = vmul.f32 %v3374_v17, %v3042_v26  ;;  %v2787_v13 = vadd.f32 %v2701_v60, %v5541_v11  ;;  %v2788_v61 = vadd.f32 %v2708_v43, %v5544_v63  ;;  %v6645_v63 = vld [vmem:[#allocation21_spill] sm:$0xff]  ;;  %v6648_v43 = vld [vmem:[#allocation20_spill] sm:$0xff] }
 0x1e2   : > { %v2829_v6 = vadd.f32 %v5576_v57, %v2785_v0  ;;  %v3434_v44 = vcombine.high %v5764_v41, %v5766_v2  ;;  %v5883_v24 = vpop.f32.mrb[33].mxu0  ;;  %v2830_v56 = vadd.f32 %v5588_v47, %v2786_v29  ;;  %v3511_v16 = vcombine.low %v5816_v12, %v5824_v5 }
 0x1e3   : > { %v4372_v30 = vcombine.high %v5766_v2, %v3433_v7  ;;  %v2831_v17 = vadd.f32 %v5576_v57, %v2787_v13  ;;  %v2832_v3 = vadd.f32 %v5588_v47, %v2788_v61  ;;  %v2714_v33 = vrot.slane %v6645_v63, 1 }
 0x1e4   : > { %v2861_v46 = vmax.f32 %v2829_v6, 0.0  ;;  %v4371_v11 = vcombine.low %v3434_v44, %v5764_v41  ;;  %v2862_v53 = vmax.f32 %v2830_v56, 0.0  ;;  %3543 = vrot.lane.b32.xlu0 %v3511_v16, %s4535_s16  ;;  %v6647_v40 = vrot.slane %v6646_v58, 2  ;;  %v6650_v6 = vld [vmem:[#allocation22_spill] sm:$0xff] }
 0x1e5   : > { %v5895_v34 = vadd.f32 %v4372_v30, %v5766_v2  ;;  %v2863_v55 = vmax.f32 %v2831_v17, 0.0  ;;  %v2864_v18 = vmax.f32 %v2832_v3, 0.0  ;;  %v2715_v0 = vadd.f32 %v2714_v33, %v6645_v63 }
 0x1e6   : > { %v2956_v48 = vrot.slane %v2861_v46, %v5552_v32  ;;  %v2720_v22 = vadd.f32 %v6647_v40, %v6646_v58  ;;  %v5902_v8 = vadd.f32 %v4371_v11, %v5764_v41  ;;  %v2960_v26 = vrot.slane %v2862_v53, %v5552_v32 }
 0x1e7   : > { %v6649_v2 = vrot.slane %v6648_v43, 2  ;;  %v2733_v7 = vrot.slane %v6650_v6, 2  ;;  %v2964_v13 = vrot.slane %v2863_v55, %v5552_v32  ;;  %v2968_v61 = vrot.slane %v2864_v18, %v5552_v32 }
 0x1e8   : > { %v2721_v60 = vrot.slane %v2720_v22, 1  ;;  %v3513_v44 = vcombine.low %v5902_v8, %v5895_v34  ;;  %v2789_v41 = vadd.f32 %v2715_v0, %v5546_v14  ;;  %v3043_v56 = vcombine.low %v2956_v48, %v2960_v26  ;;  %v6651_v48 = vld [vmem:[#allocation27_spill] sm:$0xff]  ;;  %v6652_v0 = vld [vmem:[#allocation2_spill] sm:$0xff] }
 0x1e9   : > { %v2727_v29 = vadd.f32 %v6649_v2, %v6648_v43  ;;  %v2734_v16 = vadd.f32 %v2733_v7, %v6650_v6  ;;  %v3044_v17 = vcombine.low %v2964_v13, %v2968_v61  ;;  %v3236_v11 = vadd.f32 %v5829_v54, %v5623_v62  ;;  %v6655_v43 = vld [vmem:[#allocation3_spill] sm:$0xff] }
 0x1ea   : > { %v2722_v46 = vadd.f32 %v2721_v60, %v2720_v22  ;;  %3545 = vrot.lane.b32.xlu1 %v3513_v44, %s4535_s16  ;;  %v2833_v3 = vadd.f32 %v5576_v57, %v2789_v41  ;;  %v5921_v63 = vadd.f32 %v3239_v36, %v5586_v27  ;;  %v5923_v33 = vmul.f32 %v3375_v28, %v3043_v56  ;;  %v6656_v44 = vld [vmem:[#allocation24_spill] sm:$0xff]  ;;  %v6657_v56 = vld [vmem:[#allocation25_spill] sm:$0xff] }
 0x1eb   : > { %v2728_v30 = vrot.slane %v2727_v29, 1  ;;  %v2735_v14 = vrot.slane %v2734_v16, 1  ;;  %v5929_v40 = vmul.f32 %v3376_v20, %v3044_v17  ;;  %v3377_v55 = vcombine.low %v5871_v35, %v3236_v11  ;;  %v6653_v20 = vld [vmem:[#allocation23_spill] sm:$0xff] }
 0x1ec   : > { %v2790_v58 = vadd.f32 %v2722_v46, %v6651_v48  ;;  %v2865_v22 = vmax.f32 %v2833_v3, 0.0  ;;  %v3378_v18 = vcombine.high %v5871_v35, %v3236_v11  ;;  %v3435_v36 = vcombine.low %v5783_v51, %v5785_v23 }
 0x1ed   : > { %v2729_v53 = vadd.f32 %v2728_v30, %v2727_v29  ;;  %v2736_v54 = vadd.f32 %v2735_v14, %v2734_v16  ;;  %v3436_v19 = vcombine.high %v5783_v51, %v5785_v23  ;;  %v3514_v25 = vcombine.high %v5902_v8, %v5895_v34 }
 0x1ee   : > { %v2834_v28 = vadd.f32 %v5588_v47, %v2790_v58  ;;  %v2972_v26 = vrot.slane %v2865_v22, %v5552_v32  ;;  %v6654_v60 = vrot.slane %v6653_v20, 2  ;;  %v4374_v7 = vcombine.high %v5785_v23, %v3435_v36 }
 0x1ef   : > { %v2791_v27 = vadd.f32 %v2729_v53, %v6652_v0  ;;  %v2792_v2 = vadd.f32 %v2736_v54, %v6655_v43  ;;  %v4373_v13 = vcombine.low %v3436_v19, %v5783_v51  ;;  %3561 = vrot.lane.b32.xlu0 %v3514_v25, %s4535_s16  ;;  %v2747_v41 = vrot.slane %v6656_v44, 2  ;;  %v6658_v0 = vld [vmem:[#allocation26_spill] sm:$0xff]  ;;  %v6659_v19 = vld [vmem:[#allocation4_spill] sm:$0xff] }
 0x1f0   : > { %v2741_v35 = vadd.f32 %v6654_v60, %v6653_v20  ;;  %v2866_v6 = vmax.f32 %v2834_v28, 0.0  ;;  %v2754_v46 = vrot.slane %v6657_v56, 2  ;;  %v5955_v3 = vadd.f32 %v4374_v7, %v5785_v23 }
 0x1f1   : > { %v2835_v29 = vadd.f32 %v5576_v57, %v2791_v27  ;;  %v2836_v30 = vadd.f32 %v5588_v47, %v2792_v2  ;;  %v5958_v11 = vadd.f32 %v4373_v13, %v5783_v51  ;;  %v2748_v14 = vadd.f32 %v2747_v41, %v6656_v44 }
 0x1f2   : > { %v2742_v61 = vrot.slane %v2741_v35, 1  ;;  %v2976_v17 = vrot.slane %v2866_v6, %v5552_v32  ;;  %v2755_v48 = vadd.f32 %v2754_v46, %v6657_v56  ;;  %v2761_v27 = vrot.slane %v6658_v0, 2 }
 0x1f3   : > { %v2867_v16 = vmax.f32 %v2835_v29, 0.0  ;;  %v2868_v58 = vmax.f32 %v2836_v30, 0.0  ;;  %v3515_v28 = vcombine.low %v5958_v11, %v5955_v3  ;;  %v2749_v36 = vrot.slane %v2748_v14, 1 }
 0x1f4   : > { %v2743_v53 = vadd.f32 %v2742_v61, %v2741_v35  ;;  %v3045_v54 = vcombine.low %v2972_v26, %v2976_v17  ;;  %v2756_v23 = vrot.slane %v2755_v48, 1  ;;  %v2762_v60 = vadd.f32 %v2761_v27, %v6658_v0 }
 0x1f5   : > { %v2980_v22 = vrot.slane %v2867_v16, %v5552_v32  ;;  %v2984_v51 = vrot.slane %v2868_v58, %v5552_v32  ;;  %v3242_v35 = vadd.f32 %v5851_v39, %v5623_v62  ;;  %3547 = vrot.lane.b32.xlu1 %v3515_v28, %s4535_s16  ;;  %v2750_v26 = vadd.f32 %v2749_v36, %v2748_v14 }
 0x1f6   : > { %v2793_v25 = vadd.f32 %v2743_v53, %v6659_v19  ;;  %v3409_v20 = vmul.f32 %v3377_v55, %v3045_v54  ;;  %v2757_v43 = vadd.f32 %v2756_v23, %v2755_v48  ;;  %v5975_v29 = vadd.f32 %v5875_v21, %v5701_v4 }
 0x1f7   : > { %v3046_v6 = vcombine.low %v2980_v22, %v2984_v51  ;;  %v2763_v7 = vrot.slane %v2762_v60, 1  ;;  %v3379_v13 = vcombine.low %v5921_v63, %v3242_v35  ;;  %v3380_v55 = vcombine.high %v5921_v63, %v3242_v35 }
 0x1f8   : > { %v2837_v2 = vadd.f32 %v5576_v57, %v2793_v25  ;;  %v2794_v61 = vadd.f32 %v2750_v26, %v5755_v50  ;;  %v2795_v62 = vadd.f32 %v2757_v43, %v5856_v37  ;;  %v3516_v56 = vcombine.high %v5958_v11, %v5955_v3 }
 0x1f9   : > { %v3410_v44 = vmul.f32 %v3378_v18, %v3046_v6  ;;  %v2764_v41 = vadd.f32 %v2763_v7, %v2762_v60  ;;  %v3437_v21 = vcombine.low %v5831_v1, %v5877_v49  ;;  %v3438_v50 = vcombine.high %v5831_v1, %v5877_v49 }
 0x1fa   : > { %v2869_v39 = vmax.f32 %v2837_v2, 0.0  ;;  %v2838_v46 = vadd.f32 %v5588_v47, %v2794_v61  ;;  %v2839_v30 = vadd.f32 %v5576_v57, %v2795_v62  ;;  %3563 = vrot.lane.b32.xlu1 %v3516_v56, %s4535_s16  ;;  %v5995_v18 = vadd.f32 %v5883_v24, %v5701_v4 }
 0x1fb   : > { %v2796_v37 = vadd.f32 %v2764_v41, %v5866_v10  ;;  %v4376_v63 = vcombine.high %v5877_v49, %v3437_v21  ;;  %v3439_v17 = vcombine.low %v5923_v33, %v5929_v40  ;;  %v4375_v14 = vcombine.low %v3438_v50, %v5831_v1 }
 0x1fc   : > { %v2988_v16 = vrot.slane %v2869_v39, %v5552_v32  ;;  %v2870_v53 = vmax.f32 %v2838_v46, 0.0  ;;  %v2871_v57 = vmax.f32 %v2839_v30, 0.0  ;;  %v3440_v48 = vcombine.high %v5923_v33, %v5929_v40 }
 0x1fd   : > { %v2840_v10 = vadd.f32 %v5588_v47, %v2796_v37  ;;  %v6004_v58 = vadd.f32 %v4376_v63, %v5877_v49  ;;  %v4378_v22 = vcombine.high %v5929_v40, %v3439_v17  ;;  %v6010_v54 = vadd.f32 %v4375_v14, %v5831_v1 }
 0x1fe   : > { %v2992_v4 = vrot.slane %v2870_v53, %v5552_v32  ;;  %v2996_v24 = vrot.slane %v2871_v57, %v5552_v32  ;;  %v4377_v0 = vcombine.low %v3440_v48, %v5923_v33  ;;  %v3441_v36 = vcombine.low %v3409_v20, %v3410_v44 }
 0x1ff   : > { %v2872_v27 = vmax.f32 %v2840_v10, 0.0  ;;  %v6014_v28 = vadd.f32 %v4378_v22, %v5929_v40  ;;  %v3442_v47 = vcombine.high %v3409_v20, %v3410_v44  ;;  %v3517_v49 = vcombine.low %v6010_v54, %v6004_v58 }
 0x200   : > { %v3047_v23 = vcombine.low %v2988_v16, %v2992_v4  ;;  %v6019_v19 = vadd.f32 %v4377_v0, %v5923_v33  ;;  %v4380_v1 = vcombine.high %v3410_v44, %v3441_v36  ;;  %v3518_v33 = vcombine.high %v6010_v54, %v6004_v58 }
 0x201   : > { %v3000_v25 = vrot.slane %v2872_v27, %v5552_v32  ;;  %v4379_v51 = vcombine.low %v3442_v47, %v3409_v20  ;;  %3549 = vrot.lane.b32.xlu0 %v3517_v49, %s4535_s16  ;;  %v6660_v56 = vlaneseq }
 0x202   : > { %v3411_v60 = vmul.f32 %v3379_v13, %v3047_v23  ;;  %v3519_v40 = vcombine.low %v6019_v19, %v6014_v28  ;;  %v6027_v43 = vadd.f32 %v4380_v1, %v3410_v44  ;;  %v3520_v32 = vcombine.high %v6019_v19, %v6014_v28 }
 0x203   : > { %v3048_v35 = vcombine.low %v2996_v24, %v3000_v25  ;;  %v6025_v26 = vadd.f32 %v4379_v51, %v3409_v20  ;;  %v6053_v21 = vand.u32 127, %v6660_v56 }
 0x204   : > { %3551 = vrot.lane.b32.xlu1 %v3519_v40, %s4535_s16 }
 0x205   : > { %v3412_v2 = vmul.f32 %v3380_v55, %v3048_v35  ;;  %3565 = vrot.lane.b32.xlu0 %v3518_v33, %s4535_s16  ;;  %v3521_v6 = vcombine.low %v6025_v26, %v6027_v43  ;;  %v3522_v55 = vcombine.high %v6025_v26, %v6027_v43  ;;  %vm3575_vm7 = vcmp.lt.s32.totalorder %v6053_v21, 64 }
 0x206   : > { %vm3736_vm8 = vcmp.lt.s32.totalorder %v6053_v21, 32  ;;  %vm3897_vm9 = vcmp.lt.s32.totalorder %v6053_v21, 16  ;;  %vm4058_vm10 = vcmp.lt.s32.totalorder %v6053_v21, 8 }
 0x207   : > { %v3443_v7 = vcombine.low %v3411_v60, %v3412_v2  ;;  %v3444_v13 = vcombine.high %v3411_v60, %v3412_v2 }
 0x208   : > { %3567 = vrot.lane.b32.xlu1 %v3520_v32, %s4535_s16 }
 0x209   : > { %v4381_v20 = vcombine.low %v3444_v13, %v3411_v60  ;;  %v4382_v61 = vcombine.high %v3412_v2, %v3443_v7  ;;  %3553 = vrot.lane.b32.xlu0 %v3521_v6, %s4535_s16 }
 0x20b   : > { %v6039_v62 = vadd.f32 %v4381_v20, %v3411_v60  ;;  %v6041_v39 = vadd.f32 %v4382_v61, %v3412_v2 }
 0x20d   : > { %v3523_v44 = vcombine.low %v6039_v62, %v6041_v39  ;;  %3569 = vrot.lane.b32.xlu0 %v3522_v55, %s4535_s16  ;;  %v3524_v41 = vcombine.high %v6039_v62, %v6041_v39 }
 0x20f   : > { %3555 = vrot.lane.b32.xlu1 %v3523_v44, %s4535_s16 }
 0x213   : > { %3571 = vrot.lane.b32.xlu1 %v3524_v41, %s4535_s16 }
 0x246   : > { %v3542_v46 = vpop.permute.xlu0 %3541 }
 0x24b   : > { %v3558_v30 = vpop.permute.xlu0 %3557 }
 0x24c   : > { %v3576_v16 = vsel %vm3575_vm7, %v3542_v46, %v3558_v30  ;;  %v3584_v50 = vsel %vm3575_vm7, %v3558_v30, %v3542_v46 }
 0x24d   : > { %v3608_v37 = vcombine.low %v3584_v50, %v3576_v16  ;;  %v3609_v63 = vcombine.high %v3584_v50, %v3576_v16 }
 0x24f   : > { %v6061_v17 = vadd.f32 %v3608_v37, %v5773_v42  ;;  %v6064_v53 = vadd.f32 %v3609_v63, %v5779_v45  ;;  %v3560_v48 = vpop.permute.xlu1 %3559 }
 0x251   : > { %v3672_v57 = vcombine.low %v6061_v17, %v6064_v53  ;;  %v3673_v14 = vcombine.high %v6061_v17, %v6064_v53 }
 0x253   : > { %3704 = vrot.lane.b32.xlu0 %v3672_v57, %s4536_s20 }
 0x256   : > { %v3544_v10 = vpop.permute.xlu0 %3543 }
 0x257   : > { %v3577_v22 = vsel %vm3575_vm7, %v3544_v10, %v3560_v48  ;;  %v3585_v42 = vsel %vm3575_vm7, %v3560_v48, %v3544_v10  ;;  %3720 = vrot.lane.b32.xlu0 %v3673_v14, %s4536_s20 }
 0x258   : > { %v3610_v45 = vcombine.low %v3585_v42, %v3577_v22  ;;  %v3611_v4 = vcombine.high %v3585_v42, %v3577_v22 }
 0x25a   : > { %v6077_v24 = vadd.f32 %v3610_v45, %v5816_v12  ;;  %v6080_v0 = vadd.f32 %v3611_v4, %v5824_v5 }
 0x25c   : > { %v3674_v27 = vcombine.low %v6077_v24, %v6080_v0  ;;  %v3675_v36 = vcombine.high %v6077_v24, %v6080_v0  ;;  %v3546_v47 = vpop.permute.xlu1 %3545 }
 0x25e   : > { %3706 = vrot.lane.b32.xlu1 %v3674_v27, %s4536_s20 }
 0x261   : > { %v3562_v23 = vpop.permute.xlu0 %3561 }
 0x262   : > { %v3578_v49 = vsel %vm3575_vm7, %v3546_v47, %v3562_v23  ;;  %v3586_v12 = vsel %vm3575_vm7, %v3562_v23, %v3546_v47  ;;  %3722 = vrot.lane.b32.xlu1 %v3675_v36, %s4536_s20 }
 0x263   : > { %v3612_v5 = vcombine.low %v3586_v12, %v3578_v49  ;;  %v3613_v25 = vcombine.high %v3586_v12, %v3578_v49 }
 0x265   : > { %v6093_v51 = vadd.f32 %v3612_v5, %v5902_v8  ;;  %v6096_v1 = vadd.f32 %v3613_v25, %v5895_v34 }
 0x267   : > { %v3548_v60 = vpop.permute.xlu1 %3547  ;;  %v3676_v40 = vcombine.low %v6093_v51, %v6096_v1  ;;  %v3677_v35 = vcombine.high %v6093_v51, %v6096_v1 }
 0x269   : > { %3708 = vrot.lane.b32.xlu0 %v3676_v40, %s4536_s20 }
 0x26c   : > { %v3564_v33 = vpop.permute.xlu1 %3563 }
 0x26d   : > { %v3579_v2 = vsel %vm3575_vm7, %v3548_v60, %v3564_v33  ;;  %v3587_v8 = vsel %vm3575_vm7, %v3564_v33, %v3548_v60  ;;  %3724 = vrot.lane.b32.xlu0 %v3677_v35, %s4536_s20 }
 0x26e   : > { %v3614_v34 = vcombine.low %v3587_v8, %v3579_v2  ;;  %v3615_v32 = vcombine.high %v3587_v8, %v3579_v2 }
 0x270   : > { %v6109_v6 = vadd.f32 %v3614_v34, %v5958_v11  ;;  %v6112_v7 = vadd.f32 %v3615_v32, %v5955_v3 }
 0x272   : > { %v3678_v13 = vcombine.low %v6109_v6, %v6112_v7  ;;  %v3679_v55 = vcombine.high %v6109_v6, %v6112_v7 }
 0x273   : > { %v3550_v20 = vpop.permute.xlu0 %3549 }
 0x274   : > { %3710 = vrot.lane.b32.xlu1 %v3678_v13, %s4536_s20 }
 0x276   : > { %v3552_v61 = vpop.permute.xlu1 %3551 }
 0x277   : > { %v3566_v44 = vpop.permute.xlu0 %3565 }
 0x278   : > { %v3580_v41 = vsel %vm3575_vm7, %v3550_v20, %v3566_v44  ;;  %v3588_v11 = vsel %vm3575_vm7, %v3566_v44, %v3550_v20  ;;  %3726 = vrot.lane.b32.xlu1 %v3679_v55, %s4536_s20 }
 0x279   : > { %v3616_v3 = vcombine.low %v3588_v11, %v3580_v41  ;;  %v3617_v56 = vcombine.high %v3588_v11, %v3580_v41 }
 0x27a   : > { %v3568_v46 = vpop.permute.xlu1 %3567 }
 0x27b   : > { %v3581_v30 = vsel %vm3575_vm7, %v3552_v61, %v3568_v46  ;;  %v3589_v16 = vsel %vm3575_vm7, %v3568_v46, %v3552_v61  ;;  %v6129_v50 = vadd.f32 %v3616_v3, %v6010_v54  ;;  %v6132_v37 = vadd.f32 %v3617_v56, %v6004_v58  ;;  %v3554_v14 = vpop.permute.xlu0 %3553 }
 0x27c   : > { %v3618_v63 = vcombine.low %v3589_v16, %v3581_v30  ;;  %v3619_v57 = vcombine.high %v3589_v16, %v3581_v30 }
 0x27d   : > { %v3680_v22 = vcombine.low %v6129_v50, %v6132_v37 }
 0x27e   : > { %v6135_v48 = vadd.f32 %v3618_v63, %v6019_v19  ;;  %v6138_v10 = vadd.f32 %v3619_v57, %v6014_v28  ;;  %v3681_v28 = vcombine.high %v6129_v50, %v6132_v37 }
 0x27f   : > { %3712 = vrot.lane.b32.xlu0 %v3680_v22, %s4536_s20  ;;  %v3570_v42 = vpop.permute.xlu0 %3569 }
 0x280   : > { %v3682_v54 = vcombine.low %v6135_v48, %v6138_v10  ;;  %v3582_v58 = vsel %vm3575_vm7, %v3554_v14, %v3570_v42  ;;  %v3590_v45 = vsel %vm3575_vm7, %v3570_v42, %v3554_v14  ;;  %v3683_v23 = vcombine.high %v6135_v48, %v6138_v10 }
 0x281   : > { %v3556_v19 = vpop.permute.xlu1 %3555  ;;  %v3620_v4 = vcombine.low %v3590_v45, %v3582_v58  ;;  %v3621_v27 = vcombine.high %v3590_v45, %v3582_v58 }
 0x282   : > { %3714 = vrot.lane.b32.xlu1 %v3682_v54, %s4536_s20 }
 0x283   : > { %v6153_v36 = vadd.f32 %v3620_v4, %v6025_v26  ;;  %v6156_v47 = vadd.f32 %v3621_v27, %v6027_v43  ;;  %3728 = vrot.lane.b32.xlu0 %v3681_v28, %s4536_s20 }
 0x285   : > { %v3572_v49 = vpop.permute.xlu1 %3571  ;;  %v3684_v25 = vcombine.low %v6153_v36, %v6156_v47  ;;  %v3685_v35 = vcombine.high %v6153_v36, %v6156_v47 }
 0x286   : > { %v3583_v12 = vsel %vm3575_vm7, %v3556_v19, %v3572_v49  ;;  %v3591_v5 = vsel %vm3575_vm7, %v3572_v49, %v3556_v19  ;;  %3730 = vrot.lane.b32.xlu1 %v3683_v23, %s4536_s20 }
 0x287   : > { %v3622_v26 = vcombine.low %v3591_v5, %v3583_v12  ;;  %v3623_v43 = vcombine.high %v3591_v5, %v3583_v12  ;;  %3716 = vrot.lane.b32.xlu0 %v3684_v25, %s4536_s20 }
 0x289   : > { %v6170_v60 = vadd.f32 %v3622_v26, %v6039_v62  ;;  %v6173_v40 = vadd.f32 %v3623_v43, %v6041_v39 }
 0x28b   : > { %v3686_v33 = vcombine.low %v6170_v60, %v6173_v40  ;;  %3732 = vrot.lane.b32.xlu0 %v3685_v35, %s4536_s20  ;;  %v3687_v2 = vcombine.high %v6170_v60, %v6173_v40 }
 0x28d   : > { %3718 = vrot.lane.b32.xlu1 %v3686_v33, %s4536_s20 }
 0x291   : > { %3734 = vrot.lane.b32.xlu1 %v3687_v2, %s4536_s20 }
 0x2c5   : > { %v3705_v62 = vpop.permute.xlu0 %3704 }
 0x2c9   : > { %v3721_v39 = vpop.permute.xlu0 %3720 }
 0x2ca   : > { %v3737_v8 = vsel %vm3736_vm8, %v3705_v62, %v3721_v39  ;;  %v3745_v34 = vsel %vm3736_vm8, %v3721_v39, %v3705_v62 }
 0x2cb   : > { %v3769_v32 = vcombine.low %v3745_v34, %v3737_v8  ;;  %v3770_v13 = vcombine.high %v3745_v34, %v3737_v8 }
 0x2cd   : > { %v6190_v20 = vadd.f32 %v3769_v32, %v6061_v17  ;;  %v6193_v61 = vadd.f32 %v3770_v13, %v6064_v53 }
 0x2cf   : > { %v3833_v55 = vcombine.low %v6190_v20, %v6193_v61  ;;  %v3834_v41 = vcombine.high %v6190_v20, %v6193_v61 }
 0x2d0   : > { %v3707_v44 = vpop.permute.xlu1 %3706 }
 0x2d1   : > { %3865 = vrot.lane.b32.xlu0 %v3833_v55, %s4537_s17 }
 0x2d4   : > { %v3723_v11 = vpop.permute.xlu1 %3722 }
 0x2d5   : > { %v3738_v3 = vsel %vm3736_vm8, %v3707_v44, %v3723_v11  ;;  %v3746_v17 = vsel %vm3736_vm8, %v3723_v11, %v3707_v44  ;;  %3881 = vrot.lane.b32.xlu0 %v3834_v41, %s4537_s17 }
 0x2d6   : > { %v3771_v53 = vcombine.low %v3746_v17, %v3738_v3  ;;  %v3772_v56 = vcombine.high %v3746_v17, %v3738_v3 }
 0x2d8   : > { %v6206_v46 = vadd.f32 %v3771_v53, %v6077_v24  ;;  %v6209_v30 = vadd.f32 %v3772_v56, %v6080_v0 }
 0x2da   : > { %v3835_v16 = vcombine.low %v6206_v46, %v6209_v30  ;;  %v3836_v57 = vcombine.high %v6206_v46, %v6209_v30 }
 0x2db   : > { %v3709_v63 = vpop.permute.xlu0 %3708 }
 0x2dc   : > { %3867 = vrot.lane.b32.xlu1 %v3835_v16, %s4537_s17 }
 0x2df   : > { %v3725_v14 = vpop.permute.xlu0 %3724 }
 0x2e0   : > { %v3739_v22 = vsel %vm3736_vm8, %v3709_v63, %v3725_v14  ;;  %v3747_v24 = vsel %vm3736_vm8, %v3725_v14, %v3709_v63  ;;  %3883 = vrot.lane.b32.xlu1 %v3836_v57, %s4537_s17 }
 0x2e1   : > { %v3773_v0 = vcombine.low %v3747_v24, %v3739_v22  ;;  %v3774_v42 = vcombine.high %v3747_v24, %v3739_v22 }
 0x2e3   : > { %v6222_v54 = vadd.f32 %v3773_v0, %v6093_v51  ;;  %v6225_v58 = vadd.f32 %v3774_v42, %v6096_v1 }
 0x2e5   : > { %v3837_v45 = vcombine.low %v6222_v54, %v6225_v58  ;;  %v3838_v4 = vcombine.high %v6222_v54, %v6225_v58 }
 0x2e6   : > { %v3711_v19 = vpop.permute.xlu1 %3710 }
 0x2e7   : > { %3869 = vrot.lane.b32.xlu0 %v3837_v45, %s4537_s17 }
 0x2ea   : > { %v3727_v27 = vpop.permute.xlu1 %3726 }
 0x2eb   : > { %v3740_v28 = vsel %vm3736_vm8, %v3711_v19, %v3727_v27  ;;  %v3748_v51 = vsel %vm3736_vm8, %v3727_v27, %v3711_v19  ;;  %3885 = vrot.lane.b32.xlu0 %v3838_v4, %s4537_s17 }
 0x2ec   : > { %v3775_v1 = vcombine.low %v3748_v51, %v3740_v28  ;;  %v3776_v23 = vcombine.high %v3748_v51, %v3740_v28 }
 0x2ee   : > { %v6238_v49 = vadd.f32 %v3775_v1, %v6109_v6  ;;  %v6241_v12 = vadd.f32 %v3776_v23, %v6112_v7 }
 0x2f0   : > { %v3839_v5 = vcombine.low %v6238_v49, %v6241_v12  ;;  %v3840_v43 = vcombine.high %v6238_v49, %v6241_v12 }
 0x2f1   : > { %v3713_v25 = vpop.permute.xlu0 %3712 }
 0x2f2   : > { %3871 = vrot.lane.b32.xlu1 %v3839_v5, %s4537_s17 }
 0x2f4   : > { %v3715_v26 = vpop.permute.xlu1 %3714 }
 0x2f5   : > { %v3729_v35 = vpop.permute.xlu0 %3728 }
 0x2f6   : > { %v3741_v33 = vsel %vm3736_vm8, %v3713_v25, %v3729_v35  ;;  %v3749_v6 = vsel %vm3736_vm8, %v3729_v35, %v3713_v25  ;;  %3887 = vrot.lane.b32.xlu1 %v3840_v43, %s4537_s17 }
 0x2f7   : > { %v3777_v7 = vcombine.low %v3749_v6, %v3741_v33  ;;  %v3778_v2 = vcombine.high %v3749_v6, %v3741_v33 }
 0x2f8   : > { %v3731_v62 = vpop.permute.xlu1 %3730 }
 0x2f9   : > { %v3742_v39 = vsel %vm3736_vm8, %v3715_v26, %v3731_v62  ;;  %v3750_v8 = vsel %vm3736_vm8, %v3731_v62, %v3715_v26  ;;  %v6258_v34 = vadd.f32 %v3777_v7, %v6129_v50  ;;  %v6261_v32 = vadd.f32 %v3778_v2, %v6132_v37  ;;  %v3717_v13 = vpop.permute.xlu0 %3716 }
 0x2fa   : > { %v3779_v55 = vcombine.low %v3750_v8, %v3742_v39  ;;  %v3780_v44 = vcombine.high %v3750_v8, %v3742_v39 }
 0x2fb   : > { %v3841_v3 = vcombine.low %v6258_v34, %v6261_v32 }
 0x2fc   : > { %v6264_v41 = vadd.f32 %v3779_v55, %v6135_v48  ;;  %v6267_v11 = vadd.f32 %v3780_v44, %v6138_v10  ;;  %v3842_v10 = vcombine.high %v6258_v34, %v6261_v32 }
 0x2fd   : > { %3873 = vrot.lane.b32.xlu0 %v3841_v3, %s4537_s17  ;;  %v3733_v17 = vpop.permute.xlu0 %3732 }
 0x2fe   : > { %v3843_v50 = vcombine.low %v6264_v41, %v6267_v11  ;;  %v3743_v37 = vsel %vm3736_vm8, %v3717_v13, %v3733_v17  ;;  %v3751_v53 = vsel %vm3736_vm8, %v3733_v17, %v3717_v13  ;;  %v3844_v14 = vcombine.high %v6264_v41, %v6267_v11 }
 0x2ff   : > { %v3719_v48 = vpop.permute.xlu1 %3718  ;;  %v3781_v56 = vcombine.low %v3751_v53, %v3743_v37  ;;  %v3782_v16 = vcombine.high %v3751_v53, %v3743_v37 }
 0x300   : > { %3875 = vrot.lane.b32.xlu1 %v3843_v50, %s4537_s17 }
 0x301   : > { %v6282_v63 = vadd.f32 %v3781_v56, %v6153_v36  ;;  %v6285_v57 = vadd.f32 %v3782_v16, %v6156_v47  ;;  %3889 = vrot.lane.b32.xlu0 %v3842_v10, %s4537_s17 }
 0x303   : > { %v3735_v22 = vpop.permute.xlu1 %3734  ;;  %v3845_v42 = vcombine.low %v6282_v63, %v6285_v57  ;;  %v3846_v4 = vcombine.high %v6282_v63, %v6285_v57 }
 0x304   : > { %v3744_v24 = vsel %vm3736_vm8, %v3719_v48, %v3735_v22  ;;  %v3752_v0 = vsel %vm3736_vm8, %v3735_v22, %v3719_v48  ;;  %3891 = vrot.lane.b32.xlu1 %v3844_v14, %s4537_s17 }
 0x305   : > { %v3783_v36 = vcombine.low %v3752_v0, %v3744_v24  ;;  %v3784_v47 = vcombine.high %v3752_v0, %v3744_v24  ;;  %3877 = vrot.lane.b32.xlu0 %v3845_v42, %s4537_s17 }
 0x307   : > { %v6299_v45 = vadd.f32 %v3783_v36, %v6170_v60  ;;  %v6302_v19 = vadd.f32 %v3784_v47, %v6173_v40 }
 0x309   : > { %v3847_v27 = vcombine.low %v6299_v45, %v6302_v19  ;;  %3893 = vrot.lane.b32.xlu0 %v3846_v4, %s4537_s17  ;;  %v3848_v28 = vcombine.high %v6299_v45, %v6302_v19 }
 0x30b   : > { %3879 = vrot.lane.b32.xlu1 %v3847_v27, %s4537_s17 }
 0x30f   : > { %3895 = vrot.lane.b32.xlu1 %v3848_v28, %s4537_s17 }
 0x343   : > { %v3866_v60 = vpop.permute.xlu0 %3865 }
 0x347   : > { %v3882_v40 = vpop.permute.xlu0 %3881 }
 0x348   : > { %v3898_v51 = vsel %vm3897_vm9, %v3866_v60, %v3882_v40  ;;  %v3906_v1 = vsel %vm3897_vm9, %v3882_v40, %v3866_v60 }
 0x349   : > { %v3930_v23 = vcombine.low %v3906_v1, %v3898_v51  ;;  %v3931_v5 = vcombine.high %v3906_v1, %v3898_v51 }
 0x34b   : > { %v6319_v25 = vadd.f32 %v3930_v23, %v6190_v20  ;;  %v6322_v26 = vadd.f32 %v3931_v5, %v6193_v61 }
 0x34d   : > { %v3994_v43 = vcombine.low %v6319_v25, %v6322_v26  ;;  %v3995_v33 = vcombine.high %v6319_v25, %v6322_v26 }
 0x34e   : > { %v3868_v35 = vpop.permute.xlu1 %3867 }
 0x34f   : > { %4026 = vrot.lane.b32.xlu0 %v3994_v43, %s4538_s18 }
 0x352   : > { %v3884_v6 = vpop.permute.xlu1 %3883 }
 0x353   : > { %v3899_v7 = vsel %vm3897_vm9, %v3868_v35, %v3884_v6  ;;  %v3907_v20 = vsel %vm3897_vm9, %v3884_v6, %v3868_v35  ;;  %4042 = vrot.lane.b32.xlu0 %v3995_v33, %s4538_s18 }
 0x354   : > { %v3932_v61 = vcombine.low %v3907_v20, %v3899_v7  ;;  %v3933_v2 = vcombine.high %v3907_v20, %v3899_v7 }
 0x356   : > { %v6335_v62 = vadd.f32 %v3932_v61, %v6206_v46  ;;  %v6338_v39 = vadd.f32 %v3933_v2, %v6209_v30 }
 0x358   : > { %v3996_v8 = vcombine.low %v6335_v62, %v6338_v39  ;;  %v3997_v55 = vcombine.high %v6335_v62, %v6338_v39 }
 0x359   : > { %v3870_v13 = vpop.permute.xlu0 %3869 }
 0x35a   : > { %4028 = vrot.lane.b32.xlu1 %v3996_v8, %s4538_s18 }
 0x35d   : > { %v3886_v44 = vpop.permute.xlu0 %3885 }
 0x35e   : > { %v3900_v3 = vsel %vm3897_vm9, %v3870_v13, %v3886_v44  ;;  %v3908_v46 = vsel %vm3897_vm9, %v3886_v44, %v3870_v13  ;;  %4044 = vrot.lane.b32.xlu1 %v3997_v55, %s4538_s18 }
 0x35f   : > { %v3934_v30 = vcombine.low %v3908_v46, %v3900_v3  ;;  %v3935_v17 = vcombine.high %v3908_v46, %v3900_v3 }
 0x361   : > { %v6351_v50 = vadd.f32 %v3934_v30, %v6222_v54  ;;  %v6354_v37 = vadd.f32 %v3935_v17, %v6225_v58 }
 0x363   : > { %v3998_v53 = vcombine.low %v6351_v50, %v6354_v37  ;;  %v3999_v56 = vcombine.high %v6351_v50, %v6354_v37 }
 0x364   : > { %v3872_v48 = vpop.permute.xlu1 %3871 }
 0x365   : > { %4030 = vrot.lane.b32.xlu0 %v3998_v53, %s4538_s18 }
 0x368   : > { %v3888_v16 = vpop.permute.xlu1 %3887 }
 0x369   : > { %v3901_v10 = vsel %vm3897_vm9, %v3872_v48, %v3888_v16  ;;  %v3909_v54 = vsel %vm3897_vm9, %v3888_v16, %v3872_v48  ;;  %4046 = vrot.lane.b32.xlu0 %v3999_v56, %s4538_s18 }
 0x36a   : > { %v3936_v58 = vcombine.low %v3909_v54, %v3901_v10  ;;  %v3937_v14 = vcombine.high %v3909_v54, %v3901_v10 }
 0x36c   : > { %v6367_v22 = vadd.f32 %v3936_v58, %v6238_v49  ;;  %v6370_v24 = vadd.f32 %v3937_v14, %v6241_v12 }
 0x36e   : > { %v4000_v0 = vcombine.low %v6367_v22, %v6370_v24  ;;  %v4001_v47 = vcombine.high %v6367_v22, %v6370_v24 }
 0x36f   : > { %v3874_v42 = vpop.permute.xlu0 %3873 }
 0x370   : > { %4032 = vrot.lane.b32.xlu1 %v4000_v0, %s4538_s18 }
 0x372   : > { %v3876_v36 = vpop.permute.xlu1 %3875 }
 0x373   : > { %v3890_v4 = vpop.permute.xlu0 %3889 }
 0x374   : > { %v3902_v27 = vsel %vm3897_vm9, %v3874_v42, %v3890_v4  ;;  %v3910_v49 = vsel %vm3897_vm9, %v3890_v4, %v3874_v42  ;;  %4048 = vrot.lane.b32.xlu1 %v4001_v47, %s4538_s18  ;;  %v4147_v42 = vcombine.high %v5995_v18, %v5995_v18 }
 0x375   : > { %v3938_v12 = vcombine.low %v3910_v49, %v3902_v27  ;;  %v3939_v28 = vcombine.high %v3910_v49, %v3902_v27 }
 0x376   : > { %v3892_v60 = vpop.permute.xlu1 %3891 }
 0x377   : > { %v3903_v40 = vsel %vm3897_vm9, %v3876_v36, %v3892_v60  ;;  %v3911_v51 = vsel %vm3897_vm9, %v3892_v60, %v3876_v36  ;;  %v6387_v1 = vadd.f32 %v3938_v12, %v6258_v34  ;;  %v6390_v23 = vadd.f32 %v3939_v28, %v6261_v32  ;;  %v3878_v5 = vpop.permute.xlu0 %3877 }
 0x378   : > { %v3940_v43 = vcombine.low %v3911_v51, %v3903_v40  ;;  %v3941_v35 = vcombine.high %v3911_v51, %v3903_v40  ;;  %v4148_v40 = vcombine.high %v5975_v29, %v5975_v29 }
 0x379   : > { %v4002_v7 = vcombine.low %v6387_v1, %v6390_v23 }
 0x37a   : > { %v6393_v33 = vadd.f32 %v3940_v43, %v6264_v41  ;;  %v6396_v6 = vadd.f32 %v3941_v35, %v6267_v11  ;;  %v4003_v11 = vcombine.high %v6387_v1, %v6390_v23 }
 0x37b   : > { %4034 = vrot.lane.b32.xlu0 %v4002_v7, %s4538_s18  ;;  %v3894_v20 = vpop.permute.xlu0 %3893 }
 0x37c   : > { %v4004_v34 = vcombine.low %v6393_v33, %v6396_v6  ;;  %v3904_v32 = vsel %vm3897_vm9, %v3878_v5, %v3894_v20  ;;  %v3912_v61 = vsel %vm3897_vm9, %v3894_v20, %v3878_v5  ;;  %v4005_v44 = vcombine.high %v6393_v33, %v6396_v6 }
 0x37d   : > { %v3880_v41 = vpop.permute.xlu1 %3879  ;;  %v3942_v2 = vcombine.low %v3912_v61, %v3904_v32  ;;  %v3943_v8 = vcombine.high %v3912_v61, %v3904_v32 }
 0x37e   : > { %4036 = vrot.lane.b32.xlu1 %v4004_v34, %s4538_s18 }
 0x37f   : > { %v6411_v13 = vadd.f32 %v3942_v2, %v6282_v63  ;;  %v6414_v55 = vadd.f32 %v3943_v8, %v6285_v57  ;;  %4050 = vrot.lane.b32.xlu0 %v4003_v11, %s4538_s18 }
 0x381   : > { %v3896_v3 = vpop.permute.xlu1 %3895  ;;  %v4006_v17 = vcombine.low %v6411_v13, %v6414_v55  ;;  %v4007_v56 = vcombine.high %v6411_v13, %v6414_v55 }
 0x382   : > { %v3905_v46 = vsel %vm3897_vm9, %v3880_v41, %v3896_v3  ;;  %v3913_v30 = vsel %vm3897_vm9, %v3896_v3, %v3880_v41  ;;  %4052 = vrot.lane.b32.xlu1 %v4005_v44, %s4538_s18 }
 0x383   : > { %v3944_v63 = vcombine.low %v3913_v30, %v3905_v46  ;;  %v3945_v57 = vcombine.high %v3913_v30, %v3905_v46  ;;  %4038 = vrot.lane.b32.xlu0 %v4006_v17, %s4538_s18 }
 0x385   : > { %v6428_v53 = vadd.f32 %v3944_v63, %v6299_v45  ;;  %v6431_v48 = vadd.f32 %v3945_v57, %v6302_v19 }
 0x387   : > { %v4008_v16 = vcombine.low %v6428_v53, %v6431_v48  ;;  %4054 = vrot.lane.b32.xlu0 %v4007_v56, %s4538_s18  ;;  %v4009_v10 = vcombine.high %v6428_v53, %v6431_v48 }
 0x389   : > { %4040 = vrot.lane.b32.xlu1 %v4008_v16, %s4538_s18 }
 0x38d   : > { %4056 = vrot.lane.b32.xlu1 %v4009_v10, %s4538_s18 }
 0x3c1   : > { %v4027_v45 = vpop.permute.xlu0 %4026 }
 0x3c5   : > { %v4043_v19 = vpop.permute.xlu0 %4042 }
 0x3c6   : > { %v4059_v54 = vsel %vm4058_vm10, %v4027_v45, %v4043_v19  ;;  %v4067_v58 = vsel %vm4058_vm10, %v4043_v19, %v4027_v45 }
 0x3c7   : > { %v4091_v14 = vcombine.low %v4067_v58, %v4059_v54  ;;  %v4092_v0 = vcombine.high %v4067_v58, %v4059_v54 }
 0x3c9   : > { %v4123_v36 = vadd.f32 %v4091_v14, %v6319_v25  ;;  %v4124_v47 = vadd.f32 %v4092_v0, %v6322_v26 }
 0x3cb   : > { %v4163_v4 = vadd.f32 %v4123_v36, %v5995_v18  ;;  %v4164_v27 = vadd.f32 %v4147_v42, %v4124_v47 }
 0x3cc   : > { %v4029_v49 = vpop.permute.xlu1 %4028 }
 0x3cd   : > { %v4195_v12 = vcombine.low %v4163_v4, %v4164_v27 }
 0x3cf   : > { %4212 = vst.msk [vmem:[%s6457_s22] sm:$0xff] %vm4211_vm11, %v4195_v12 }
 0x3d0   : > { %v4045_v28 = vpop.permute.xlu1 %4044 }
 0x3d1   : > { %v4060_v25 = vsel %vm4058_vm10, %v4029_v49, %v4045_v28  ;;  %v4068_v18 = vsel %vm4058_vm10, %v4045_v28, %v4029_v49  ;;  %v4152_v28 = vcombine.high %v5747_v38, %v5747_v38 }
 0x3d2   : > { %v4093_v26 = vcombine.low %v4068_v18, %v4060_v25  ;;  %v4094_v60 = vcombine.high %v4068_v18, %v4060_v25 }
 0x3d4   : > { %v4125_v51 = vadd.f32 %v4093_v26, %v6335_v62  ;;  %v4126_v5 = vadd.f32 %v4094_v60, %v6338_v39  ;;  %v4149_v62 = vcombine.high %v5726_v59, %v5726_v59 }
 0x3d6   : > { %v4165_v43 = vadd.f32 %v4125_v51, %v5975_v29  ;;  %v4166_v35 = vadd.f32 %v4148_v40, %v4126_v5 }
 0x3d7   : > { %v4031_v7 = vpop.permute.xlu0 %4030 }
 0x3d8   : > { %v4196_v20 = vcombine.low %v4165_v43, %v4166_v35 }
 0x3da   : > { %4213 = vst.msk [vmem:[%s6457_s22 + $0x8] sm:$0xff] %vm4211_vm11, %v4196_v20 }
 0x3db   : > { %v4047_v34 = vpop.permute.xlu0 %4046 }
 0x3dc   : > { %v4061_v32 = vsel %vm4058_vm10, %v4031_v7, %v4047_v34  ;;  %v4069_v61 = vsel %vm4058_vm10, %v4047_v34, %v4031_v7 }
 0x3dd   : > { %v4095_v41 = vcombine.low %v4069_v61, %v4061_v32  ;;  %v4096_v2 = vcombine.high %v4069_v61, %v4061_v32 }
 0x3df   : > { %v4127_v29 = vadd.f32 %v4095_v41, %v6351_v50  ;;  %v4128_v39 = vadd.f32 %v4096_v2, %v6354_v37  ;;  %v4150_v50 = vcombine.high %v5723_v15, %v5723_v15 }
 0x3e1   : > { %v4167_v8 = vadd.f32 %v4127_v29, %v5726_v59  ;;  %v4168_v11 = vadd.f32 %v4149_v62, %v4128_v39 }
 0x3e2   : > { %v4033_v44 = vpop.permute.xlu1 %4032 }
 0x3e3   : > { %v4197_v3 = vcombine.low %v4167_v8, %v4168_v11  ;;  %v4154_v8 = vcombine.high %v5849_v52, %v5849_v52 }
 0x3e5   : > { %4214 = vst.msk [vmem:[%s6457_s22 + $0x10] sm:$0xff] %vm4211_vm11, %v4197_v3 }
 0x3e6   : > { %v4049_v46 = vpop.permute.xlu1 %4048 }
 0x3e7   : > { %v4062_v30 = vsel %vm4058_vm10, %v4033_v44, %v4049_v46  ;;  %v4070_v17 = vsel %vm4058_vm10, %v4049_v46, %v4033_v44 }
 0x3e8   : > { %v4097_v63 = vcombine.low %v4070_v17, %v4062_v30  ;;  %v4098_v57 = vcombine.high %v4070_v17, %v4062_v30 }
 0x3ea   : > { %v4129_v59 = vadd.f32 %v4097_v63, %v6367_v22  ;;  %v4130_v37 = vadd.f32 %v4098_v57, %v6370_v24  ;;  %v4151_v24 = vcombine.high %v5750_v31, %v5750_v31 }
 0x3ec   : > { %v4169_v56 = vadd.f32 %v4129_v59, %v5723_v15  ;;  %v4170_v16 = vadd.f32 %v4150_v50, %v4130_v37 }
 0x3ed   : > { %v4035_v10 = vpop.permute.xlu0 %4034 }
 0x3ee   : > { %v4198_v45 = vcombine.low %v4169_v56, %v4170_v16 }
 0x3f0   : > { %v4037_v19 = vpop.permute.xlu1 %4036  ;;  %4215 = vst.msk [vmem:[%s6457_s22 + $0x18] sm:$0xff] %vm4211_vm11, %v4198_v45 }
 0x3f1   : > { %v4051_v54 = vpop.permute.xlu0 %4050 }
 0x3f2   : > { %v4063_v58 = vsel %vm4058_vm10, %v4035_v10, %v4051_v54  ;;  %v4071_v14 = vsel %vm4058_vm10, %v4051_v54, %v4035_v10 }
 0x3f3   : > { %v4099_v0 = vcombine.low %v4071_v14, %v4063_v58  ;;  %v4100_v42 = vcombine.high %v4071_v14, %v4063_v58 }
 0x3f4   : > { %v4053_v22 = vpop.permute.xlu1 %4052 }
 0x3f5   : > { %v4064_v15 = vsel %vm4058_vm10, %v4037_v19, %v4053_v22  ;;  %v4072_v36 = vsel %vm4058_vm10, %v4053_v22, %v4037_v19  ;;  %v4131_v47 = vadd.f32 %v4099_v0, %v6387_v1  ;;  %v4132_v4 = vadd.f32 %v4100_v42, %v6390_v23  ;;  %v4039_v27 = vpop.permute.xlu0 %4038 }
 0x3f6   : > { %v4101_v49 = vcombine.low %v4072_v36, %v4064_v15  ;;  %v4102_v12 = vcombine.high %v4072_v36, %v4064_v15 }
 0x3f7   : > { %v4171_v25 = vadd.f32 %v4131_v47, %v5750_v31  ;;  %v4172_v18 = vadd.f32 %v4151_v24, %v4132_v4 }
 0x3f8   : > { %v4133_v26 = vadd.f32 %v4101_v49, %v6393_v33  ;;  %v4134_v60 = vadd.f32 %v4102_v12, %v6396_v6  ;;  %v4153_v33 = vcombine.high %v5861_v9, %v5861_v9 }
 0x3f9   : > { %v4199_v40 = vcombine.low %v4171_v25, %v4172_v18  ;;  %v4055_v23 = vpop.permute.xlu0 %4054 }
 0x3fa   : > { %v4173_v1 = vadd.f32 %v4133_v26, %v5747_v38  ;;  %v4174_v51 = vadd.f32 %v4152_v28, %v4134_v60  ;;  %v4065_v5 = vsel %vm4058_vm10, %v4039_v27, %v4055_v23  ;;  %v4073_v43 = vsel %vm4058_vm10, %v4055_v23, %v4039_v27 }
 0x3fb   : > { %v4041_v35 = vpop.permute.xlu1 %4040  ;;  %4216 = vst.msk [vmem:[%s6457_s22 + $0x20] sm:$0xff] %vm4211_vm11, %v4199_v40  ;;  %v4103_v7 = vcombine.low %v4073_v43, %v4065_v5  ;;  %v4104_v20 = vcombine.high %v4073_v43, %v4065_v5 }
 0x3fc   : > { %v4200_v31 = vcombine.low %v4173_v1, %v4174_v51 }
 0x3fd   : > { %v4135_v38 = vadd.f32 %v4103_v7, %v6411_v13  ;;  %v4136_v6 = vadd.f32 %v4104_v20, %v6414_v55 }
 0x3fe   : > { %4217 = vst.msk [vmem:[%s6457_s22 + $0x28] sm:$0xff] %vm4211_vm11, %v4200_v31 }
 0x3ff   : > { %v4057_v34 = vpop.permute.xlu1 %4056  ;;  %v4175_v32 = vadd.f32 %v4135_v38, %v5861_v9  ;;  %v4176_v61 = vadd.f32 %v4153_v33, %v4136_v6 }
 0x400   : > { %v4066_v41 = vsel %vm4058_vm10, %v4041_v35, %v4057_v34  ;;  %v4074_v2 = vsel %vm4058_vm10, %v4057_v34, %v4041_v35 }
 0x401   : > { %v4105_v62 = vcombine.low %v4074_v2, %v4066_v41  ;;  %v4106_v29 = vcombine.high %v4074_v2, %v4066_v41  ;;  %v4201_v39 = vcombine.low %v4175_v32, %v4176_v61 }
 0x403   : > { %v4137_v13 = vadd.f32 %v4105_v62, %v6428_v53  ;;  %v4138_v55 = vadd.f32 %v4106_v29, %v6431_v48  ;;  %4218 = vst.msk [vmem:[%s6457_s22 + $0x30] sm:$0xff] %vm4211_vm11, %v4201_v39 }
 0x405   : > { %v4177_v9 = vadd.f32 %v4137_v13, %v5849_v52  ;;  %v4178_v11 = vadd.f32 %v4154_v8, %v4138_v55 }
 0x407   : > { %v4202_v44 = vcombine.low %v4177_v9, %v4178_v11 }
 0x409   : > { %4219 = vst.msk [vmem:[%s6457_s22 + $0x38] sm:$0xff] %vm4211_vm11, %v4202_v44 }
 0x40a PF: > { %s18_s27 = sadd.s32 1, %s4530_s27  }
 0x40b   : > { %p15_p5 = scmp.ge.s32.totalorder %s18_s27, 6  }
 0x40d   :  { %17 = sbr.rel (!%p15_p5) target bundleno = 1 (0x1), region = 85 }

</bundles_post_ra>
